<compile_context>
chip_gen: v6e
topology: v6e:2x2x1
jax: 0.10.0
libtpu: 0.0.40
codegen_flags: <defaults>
</compile_context>

<pallas_src>
import jax
import jax.numpy as jnp
from jax.experimental import pallas as pl
from jax.experimental.pallas import tpu as pltpu

LANE = 128
SUBLANE = 8


def _round_up(n, m):
    return ((n + m - 1) // m) * m


def _pad2d(a, rows, cols):
    r, c = a.shape
    return jnp.pad(a, ((0, rows - r), (0, cols - c)))


# ----------------------------------------------------------------------------
# Fused kernel: 4 residual blocks + final linear in ONE pallas_call.
# ----------------------------------------------------------------------------

def _make_fused_forward_kernel(block_metas, out_pad):
    """block_metas: per-block dict(hidden_pad=int, fused_adapter=bool)."""

    def kernel(*refs):
        # refs = (x, [w1, b1, w2, b2] per block, wf, bf, out_slab)
        x_ref = refs[0]
        out_ref = refs[-1]
        p_refs = refs[1:-1]

        x = x_ref[...]                                    # f32 activations
        off = 0
        ri = 0
        for meta in block_metas:
            hp = meta["hidden_pad"]
            w1, b1, w2, b2 = p_refs[ri:ri + 4]
            ri += 4
            # linear1 (+ fused dimension adapter) with folded batchnorm1
            y = jnp.dot(x.astype(jnp.bfloat16), w1[...],
                        preferred_element_type=jnp.float32) + b1[...]
            if meta["fused_adapter"]:
                h = jnp.maximum(y[:, :hp], 0.0)           # ReLU (lane-aligned split)
                identity = y[:, hp:]                      # adapter branch
            else:
                h = jnp.maximum(y, 0.0)
                identity = x
            # Dropout(p=0.05): identity in eval mode.
            # linear2 with folded batchnorm2
            z = jnp.dot(h.astype(jnp.bfloat16), w2[...],
                        preferred_element_type=jnp.float32) + b2[...]
            x = jnp.maximum(z + identity, 0.0)            # residual add + ReLU
            # Direct lane-aligned store of this block's embedding (no concat).
            out_ref[:, off:off + hp] = x.astype(out_ref.dtype)
            off += hp

        wf, bfin = p_refs[ri], p_refs[ri + 1]
        final = jnp.dot(x.astype(jnp.bfloat16), wf[...],
                        preferred_element_type=jnp.float32) + bfin[...]
        out_ref[:, off:off + out_pad] = final.astype(out_ref.dtype)

    return kernel


# ----------------------------------------------------------------------------
# Host-side parameter folding (BatchNorm -> Linear, adapter fusion, 128-lane
# zero padding of every feature dim, bf16 cast for MXU weights).
# ----------------------------------------------------------------------------

def fold_params(raw):
    blocks = []
    in_f = raw["blocks"][0]["w1"].shape[0]
    in_pad = _round_up(in_f, LANE)
    for p in raw["blocks"]:
        h = p["w2"].shape[1]
        h_pad = _round_up(h, LANE)
        w1 = p["w1"] * p["s1"]                 # per-output-column BN scale
        b1 = p["b1"] * p["s1"] + p["t1"]
        w2 = p["w2"] * p["s2"]
        b2 = p["b2"] * p["s2"] + p["t2"]
        # Zero-pad so padded input columns / padded hidden columns contribute 0
        # and padded output columns stay exactly 0 through the whole network.
        w1p = _pad2d(w1, in_pad, h_pad)
        b1p = _pad2d(b1, 1, h_pad)
        w2p = _pad2d(w2, h_pad, h_pad)
        b2p = _pad2d(b2, 1, h_pad)
        fused = "wa" in p
        if fused:                              # x @ [W1' | Wa] in one MXU pass
            w1p = jnp.concatenate([w1p, _pad2d(p["wa"], in_pad, h_pad)], axis=1)
            b1p = jnp.concatenate([b1p, _pad2d(p["ba"], 1, h_pad)], axis=1)
        blocks.append(dict(
            w1=w1p.astype(jnp.bfloat16), b1=b1p.astype(jnp.float32),
            w2=w2p.astype(jnp.bfloat16), b2=b2p.astype(jnp.float32),
            hidden=h, hidden_pad=h_pad, fused_adapter=fused))
        in_f, in_pad = h, h_pad
    out_f = raw["final_w"].shape[1]
    out_pad = _round_up(out_f, LANE)
    return dict(
        blocks=blocks,
        final_w=_pad2d(raw["final_w"], in_pad, out_pad).astype(jnp.bfloat16),
        final_b=_pad2d(raw["final_b"], 1, out_pad).astype(jnp.float32),
        input_size=raw["blocks"][0]["w1"].shape[0],
        output_size=out_f)


# ----------------------------------------------------------------------------
# Wrapper
# ----------------------------------------------------------------------------

def deep_residual_mlp_forward(folded, x, return_embeddings=True, block_m=None,
                              out_dtype=jnp.float32):
    batch, in_f = x.shape
    in_pad = folded["blocks"][0]["w1"].shape[0]
    if in_f != in_pad:
        # Pad input features once on the host -> full-lane loads every step.
        x = jnp.pad(x, ((0, 0), (0, in_pad - in_f)))

    hiddens = [b["hidden"] for b in folded["blocks"]]
    hidden_pads = [b["hidden_pad"] for b in folded["blocks"]]
    out_f = folded["output_size"]
    out_pad = folded["final_w"].shape[1]
    slab_width = sum(hidden_pads) + out_pad      # multiple of 128 (lane-dense)

    param_arrays = []
    for b in folded["blocks"]:
        for name in ("w1", "b1", "w2", "b2"):
            param_arrays.append(b[name])
    param_arrays += [folded["final_w"], folded["final_b"]]
    # Count weights x2 so the estimate also covers the double-buffered fallback.
    weight_bytes = 2 * sum(a.size * a.dtype.itemsize for a in param_arrays)
    widest = max(b["w1"].shape[1] for b in folded["blocks"])
    out_itemsize = jnp.dtype(out_dtype).itemsize

    def vmem_estimate(bm):
        in_tile = bm * in_pad * 4 * 2                    # f32 input, 2 bufs
        out_tile = bm * slab_width * out_itemsize * 2    # output slab, 2 bufs
        inter = bm * (in_pad + 3 * widest) * 4           # live f32 intermediates
        return in_tile + out_tile + inter + weight_bytes

    # --- batch-tile selection against an explicit VMEM budget ---------------
    VMEM_BUDGET = 36 * 1024 * 1024   # fits v7x's 64 MiB/TC with headroom
    batch_pad8 = _round_up(batch, SUBLANE)
    if block_m is not None:
        bm = min(_round_up(block_m, SUBLANE), batch_pad8)
    else:
        bm = min(batch_pad8, 2048)
        if batch_pad8 >= 256:
            # Keep >= 2 grid steps so the "parallel" batch axis can shard
            # across both TensorCores on megacore parts (v7x).
            bm = min(bm, _round_up(pl.cdiv(batch_pad8, 2), SUBLANE))
        while bm > 128 and vmem_estimate(bm) > VMEM_BUDGET:
            bm = _round_up(bm // 2, SUBLANE)
    if batch <= SUBLANE:
        bm = batch                                   # block dim == full dim is OK
    else:
        bm = max(min(bm, (batch // SUBLANE) * SUBLANE), SUBLANE)

    grid = (pl.cdiv(batch, bm),)
    # Always set the scoped-VMEM limit explicitly (v5e default is only 16 MiB).
    vmem_limit = int(min(max(vmem_estimate(bm) * 1.4, 32 * 1024 * 1024),
                         48 * 1024 * 1024))

    metas = [dict(hidden_pad=b["hidden_pad"], fused_adapter=b["fused_adapter"])
             for b in folded["blocks"]]
    kernel = _make_fused_forward_kernel(metas, out_pad)
    out_shape = jax.ShapeDtypeStruct((batch, slab_width), out_dtype)
    out_spec = pl.BlockSpec((bm, slab_width), lambda i: (i, 0))
    args = [x] + param_arrays

    def build_in_specs(single_buffer_weights):
        specs = [pl.BlockSpec((bm, in_pad), lambda i: (i, 0))]
        for arr in param_arrays:
            if single_buffer_weights:
                # Weights never change across grid steps: single-buffer them
                # (saves ~half the resident weight VMEM).
                specs.append(pl.BlockSpec(arr.shape, lambda i: (0, 0),
                                          pipeline_mode=pl.Buffered(1)))
            else:
                specs.append(pl.BlockSpec(arr.shape, lambda i: (0, 0)))
        return specs

    slab = None
    for single_buffer in (True, False):
        try:
            slab = pl.pallas_call(
                kernel,
                out_shape=out_shape,
                grid_spec=pltpu.PrefetchScalarGridSpec(
                    num_scalar_prefetch=0,
                    grid=grid,
                    in_specs=build_in_specs(single_buffer),
                    out_specs=out_spec,
                ),
                compiler_params=pltpu.CompilerParams(
                    dimension_semantics=("parallel",),
                    vmem_limit_bytes=vmem_limit,
                ),
            )(*args)
            break
        except Exception:
            if not single_buffer:
                raise
            # Fall back to default double-buffered weights if Buffered(1)
            # is not supported by this Pallas version.

    # Slice the lane-dense slab back into (output, *embeddings), dropping the
    # zero padding columns.
    embeddings = []
    off = 0
    for h, hp in zip(hiddens, hidden_pads):
        embeddings.append(slab[:, off:off + h])
        off += hp
    output = slab[:, off:off + out_f]
    if return_embeddings:
        return (output, *embeddings)
    return output


# ----------------------------------------------------------------------------
# Parameter initialization (deterministic, synthetic)
# ----------------------------------------------------------------------------

def _init_linear(key, in_f, out_f):
    kw, kb = jax.random.split(key)
    bound = 1.0 / (in_f ** 0.5)
    w = jax.random.uniform(kw, (in_f, out_f), jnp.float32, -bound, bound)
    b = jax.random.uniform(kb, (1, out_f), jnp.float32, -bound, bound)
    return w, b


def _init_batchnorm_folded(key, feat, eps=1e-5):
    kg, kb, km, kv = jax.random.split(key, 4)
    gamma = 1.0 + 0.1 * jax.random.normal(kg, (1, feat), jnp.float32)
    beta = 0.1 * jax.random.normal(kb, (1, feat), jnp.float32)
    running_mean = 0.1 * jax.random.normal(km, (1, feat), jnp.float32)
    running_var = 1.0 + 0.1 * jax.random.uniform(kv, (1, feat), jnp.float32)
    scale = gamma * jax.lax.rsqrt(running_var + eps)
    shift = beta - running_mean * scale
    return scale, shift


def init_deep_residual_mlp(key, input_size, output_size, hidden_sizes):
    blocks = []
    in_f = input_size
    for hidden in hidden_sizes:
        key, k1, k2, k3, k4, k5 = jax.random.split(key, 6)
        w1, b1 = _init_linear(k1, in_f, hidden)
        w2, b2 = _init_linear(k2, hidden, hidden)
        s1, t1 = _init_batchnorm_folded(k3, hidden)
        s2, t2 = _init_batchnorm_folded(k4, hidden)
        p = dict(w1=w1, b1=b1, s1=s1, t1=t1, w2=w2, b2=b2, s2=s2, t2=t2)
        if in_f != hidden:
            p["wa"], p["ba"] = _init_linear(k5, in_f, hidden)
        blocks.append(p)
        in_f = hidden
    key, kf = jax.random.split(key)
    wf, bf = _init_linear(kf, in_f, output_size)
    return dict(blocks=blocks, final_w=wf, final_b=bf)


# ----------------------------------------------------------------------------
# Pure-JAX references (for numerical validation)
# ----------------------------------------------------------------------------

def reference_forward_f32(raw, x):
    """Eval-mode forward, plain JAX f32, unfused (mirrors the PyTorch module)."""
    embeddings = []
    for p in raw["blocks"]:
        out = x @ p["w1"] + p["b1"]
        out = out * p["s1"] + p["t1"]          # batchnorm1 (running stats)
        out = jnp.maximum(out, 0.0)            # ReLU; dropout identity at eval
        out = out @ p["w2"] + p["b2"]
        out = out * p["s2"] + p["t2"]          # batchnorm2
        identity = (x @ p["wa"] + p["ba"]) if "wa" in p else x
        x = jnp.maximum(out + identity, 0.0)
        embeddings.append(x)
    output = x @ raw["final_w"] + raw["final_b"]
    return (output, *embeddings)


def reference_forward_folded_bf16(folded, x):
    """Same folded/padded/bf16 math as the kernel, in plain JAX."""
    in_f = folded["input_size"]
    in_pad = folded["blocks"][0]["w1"].shape[0]
    x = jnp.pad(x, ((0, 0), (0, in_pad - in_f)))
    embeddings = []
    for b in folded["blocks"]:
        y = jnp.dot(x.astype(jnp.bfloat16), b["w1"],
                    preferred_element_type=jnp.float32) + b["b1"]
        hp = b["hidden_pad"]
        if b["fused_adapter"]:
            h = jnp.maximum(y[:, :hp], 0.0)
            identity = y[:, hp:]
        else:
            h = jnp.maximum(y, 0.0)
            identity = x
        z = jnp.dot(h.astype(jnp.bfloat16), b["w2"],
                    preferred_element_type=jnp.float32) + b["b2"]
        x = jnp.maximum(z + identity, 0.0)
        embeddings.append(x[:, :b["hidden"]])
    output = jnp.dot(x.astype(jnp.bfloat16), folded["final_w"],
                     preferred_element_type=jnp.float32) + folded["final_b"]
    return (output[:, :folded["output_size"]], *embeddings)


# ----------------------------------------------------------------------------
# Main
# ----------------------------------------------------------------------------

if __name__ == "__main__":
    batch = 8
    input_size = 32
    output_size = 8
    hidden_sizes = [64, 32, 32, 16]   # scaled-down analog of [512, 256, 256, 128]

    key = jax.random.PRNGKey(0)
    key, kx, kp = jax.random.split(key, 3)

    x = jax.random.normal(kx, (batch, input_size), jnp.float32)
    raw_params = init_deep_residual_mlp(kp, input_size, output_size, hidden_sizes)
    folded_params = fold_params(raw_params)

    outs = deep_residual_mlp_forward(folded_params, x, return_embeddings=True)
    outs = jax.block_until_ready(outs)

    # Shape checks: (output, emb1..emb4)
    assert outs[0].shape == (batch, output_size)
    for emb, h in zip(outs[1:], hidden_sizes):
        assert emb.shape == (batch, h)

    # Kernel matches the identical folded/padded/bf16 math done in plain JAX.
    ref_same_math = reference_forward_folded_bf16(folded_params, x)
    for got, want in zip(outs, ref_same_math):
        assert jnp.allclose(got, want, rtol=1e-3, atol=1e-3), \
            "kernel != folded-bf16 reference"

    # Kernel matches the original (unfolded, f32) module semantics to bf16 tol.
    ref_f32 = reference_forward_f32(raw_params, x)
    for got, want in zip(outs, ref_f32):
        assert jnp.allclose(got, want, rtol=1e-1, atol=1e-1), \
            "kernel != f32 module reference"

    print("KERNEL_OK")
</pallas_src>

<mosaic_0001>
module attributes {stable_mosaic.version = 11 : i64} {
  func.func @kernel(%arg0: i32, %arg1: memref<8x128xf32, #tpu.memory_space<vmem>>, %arg2: memref<128x256xbf16, #tpu.memory_space<vmem>>, %arg3: memref<1x256xf32, #tpu.memory_space<vmem>>, %arg4: memref<128x128xbf16, #tpu.memory_space<vmem>>, %arg5: memref<1x128xf32, #tpu.memory_space<vmem>>, %arg6: memref<128x256xbf16, #tpu.memory_space<vmem>>, %arg7: memref<1x256xf32, #tpu.memory_space<vmem>>, %arg8: memref<128x128xbf16, #tpu.memory_space<vmem>>, %arg9: memref<1x128xf32, #tpu.memory_space<vmem>>, %arg10: memref<128x128xbf16, #tpu.memory_space<vmem>>, %arg11: memref<1x128xf32, #tpu.memory_space<vmem>>, %arg12: memref<128x128xbf16, #tpu.memory_space<vmem>>, %arg13: memref<1x128xf32, #tpu.memory_space<vmem>>, %arg14: memref<128x256xbf16, #tpu.memory_space<vmem>>, %arg15: memref<1x256xf32, #tpu.memory_space<vmem>>, %arg16: memref<128x128xbf16, #tpu.memory_space<vmem>>, %arg17: memref<1x128xf32, #tpu.memory_space<vmem>>, %arg18: memref<128x128xbf16, #tpu.memory_space<vmem>>, %arg19: memref<1x128xf32, #tpu.memory_space<vmem>>, %arg20: memref<8x640xf32, #tpu.memory_space<vmem>>) attributes {dimension_semantics = [#tpu.dimension_semantics<parallel>], iteration_bounds = array<i64: 1>, scalar_prefetch = 0 : i64, scratch_operands = 0 : i64, tpu.core_type = #tpu.core_type<tc>, window_params = [{transform_indices = @transform_0, window_bounds = array<i64: 8, 128>}, {pipeline_mode = #tpu.pipeline_mode<synchronous>, transform_indices = @transform_1, window_bounds = array<i64: 128, 256>}, {pipeline_mode = #tpu.pipeline_mode<synchronous>, transform_indices = @transform_2, window_bounds = array<i64: 1, 256>}, {pipeline_mode = #tpu.pipeline_mode<synchronous>, transform_indices = @transform_3, window_bounds = array<i64: 128, 128>}, {pipeline_mode = #tpu.pipeline_mode<synchronous>, transform_indices = @transform_4, window_bounds = array<i64: 1, 128>}, {pipeline_mode = #tpu.pipeline_mode<synchronous>, transform_indices = @transform_5, window_bounds = array<i64: 128, 256>}, {pipeline_mode = #tpu.pipeline_mode<synchronous>, transform_indices = @transform_6, window_bounds = array<i64: 1, 256>}, {pipeline_mode = #tpu.pipeline_mode<synchronous>, transform_indices = @transform_7, window_bounds = array<i64: 128, 128>}, {pipeline_mode = #tpu.pipeline_mode<synchronous>, transform_indices = @transform_8, window_bounds = array<i64: 1, 128>}, {pipeline_mode = #tpu.pipeline_mode<synchronous>, transform_indices = @transform_9, window_bounds = array<i64: 128, 128>}, {pipeline_mode = #tpu.pipeline_mode<synchronous>, transform_indices = @transform_10, window_bounds = array<i64: 1, 128>}, {pipeline_mode = #tpu.pipeline_mode<synchronous>, transform_indices = @transform_11, window_bounds = array<i64: 128, 128>}, {pipeline_mode = #tpu.pipeline_mode<synchronous>, transform_indices = @transform_12, window_bounds = array<i64: 1, 128>}, {pipeline_mode = #tpu.pipeline_mode<synchronous>, transform_indices = @transform_13, window_bounds = array<i64: 128, 256>}, {pipeline_mode = #tpu.pipeline_mode<synchronous>, transform_indices = @transform_14, window_bounds = array<i64: 1, 256>}, {pipeline_mode = #tpu.pipeline_mode<synchronous>, transform_indices = @transform_15, window_bounds = array<i64: 128, 128>}, {pipeline_mode = #tpu.pipeline_mode<synchronous>, transform_indices = @transform_16, window_bounds = array<i64: 1, 128>}, {pipeline_mode = #tpu.pipeline_mode<synchronous>, transform_indices = @transform_17, window_bounds = array<i64: 128, 128>}, {pipeline_mode = #tpu.pipeline_mode<synchronous>, transform_indices = @transform_18, window_bounds = array<i64: 1, 128>}, {transform_indices = @transform_19, window_bounds = array<i64: 8, 640>}]} {
    %c0 = arith.constant 0 : index
    %c0_0 = arith.constant 0 : index
    %0 = vector.load %arg1[%c0, %c0_0] : memref<8x128xf32, #tpu.memory_space<vmem>>, vector<8x128xf32>
    %1 = arith.truncf %0 : vector<8x128xf32> to vector<8x128xbf16>
    %c0_1 = arith.constant 0 : index
    %c0_2 = arith.constant 0 : index
    %2 = vector.load %arg2[%c0_1, %c0_2] : memref<128x256xbf16, #tpu.memory_space<vmem>>, vector<128x256xbf16>
    %cst = arith.constant dense<0.000000e+00> : vector<8x256xf32>
    %3 = tpu.matmul %1, %2, %cst {dimension_numbers = #tpu.dot_dimension_numbers<[1], [0], [0], [1], [0, 0, 1, 1], [], []>} : vector<8x128xbf16>, vector<128x256xbf16>, vector<8x256xf32> -> vector<8x256xf32>
    %c0_3 = arith.constant 0 : index
    %c0_4 = arith.constant 0 : index
    %4 = vector.load %arg3[%c0_3, %c0_4] : memref<1x256xf32, #tpu.memory_space<vmem>>, vector<1x256xf32>
    %5 = vector.broadcast %4 : vector<1x256xf32> to vector<8x256xf32>
    %6 = arith.addf %3, %5 : vector<8x256xf32>
    %7 = vector.extract_strided_slice %6 {offsets = [0, 0], sizes = [8, 128], strides = [1, 1]} : vector<8x256xf32> to vector<8x128xf32>
    %cst_5 = arith.constant 0.000000e+00 : f32
    %8 = vector.broadcast %cst_5 : f32 to vector<8x128xf32>
    %9 = arith.maximumf %7, %8 : vector<8x128xf32>
    %10 = vector.extract_strided_slice %6 {offsets = [0, 128], sizes = [8, 128], strides = [1, 1]} : vector<8x256xf32> to vector<8x128xf32>
    %11 = arith.truncf %9 : vector<8x128xf32> to vector<8x128xbf16>
    %c0_6 = arith.constant 0 : index
    %c0_7 = arith.constant 0 : index
    %12 = vector.load %arg4[%c0_6, %c0_7] : memref<128x128xbf16, #tpu.memory_space<vmem>>, vector<128x128xbf16>
    %cst_8 = arith.constant dense<0.000000e+00> : vector<8x128xf32>
    %13 = tpu.matmul %11, %12, %cst_8 {dimension_numbers = #tpu.dot_dimension_numbers<[1], [0], [0], [1], [0, 0, 1, 1], [], []>} : vector<8x128xbf16>, vector<128x128xbf16>, vector<8x128xf32> -> vector<8x128xf32>
    %c0_9 = arith.constant 0 : index
    %c0_10 = arith.constant 0 : index
    %14 = vector.load %arg5[%c0_9, %c0_10] : memref<1x128xf32, #tpu.memory_space<vmem>>, vector<1x128xf32>
    %15 = vector.broadcast %14 : vector<1x128xf32> to vector<8x128xf32>
    %16 = arith.addf %13, %15 : vector<8x128xf32>
    %17 = arith.addf %16, %10 : vector<8x128xf32>
    %cst_11 = arith.constant 0.000000e+00 : f32
    %18 = vector.broadcast %cst_11 : f32 to vector<8x128xf32>
    %19 = arith.maximumf %17, %18 : vector<8x128xf32>
    %c0_12 = arith.constant 0 : index
    %c0_13 = arith.constant 0 : index
    %20 = vector.load %arg20[%c0_12, %c0_13] : memref<8x640xf32, #tpu.memory_space<vmem>>, vector<8x128xf32>
    tpu.vector_store %arg20[%c0_12, %c0_13], %19 {strides = array<i32>} : memref<8x640xf32, #tpu.memory_space<vmem>>, vector<8x128xf32>,
    %21 = arith.truncf %19 : vector<8x128xf32> to vector<8x128xbf16>
    %c0_14 = arith.constant 0 : index
    %c0_15 = arith.constant 0 : index
    %22 = vector.load %arg6[%c0_14, %c0_15] : memref<128x256xbf16, #tpu.memory_space<vmem>>, vector<128x256xbf16>
    %cst_16 = arith.constant dense<0.000000e+00> : vector<8x256xf32>
    %23 = tpu.matmul %21, %22, %cst_16 {dimension_numbers = #tpu.dot_dimension_numbers<[1], [0], [0], [1], [0, 0, 1, 1], [], []>} : vector<8x128xbf16>, vector<128x256xbf16>, vector<8x256xf32> -> vector<8x256xf32>
    %c0_17 = arith.constant 0 : index
    %c0_18 = arith.constant 0 : index
    %24 = vector.load %arg7[%c0_17, %c0_18] : memref<1x256xf32, #tpu.memory_space<vmem>>, vector<1x256xf32>
    %25 = vector.broadcast %24 : vector<1x256xf32> to vector<8x256xf32>
    %26 = arith.addf %23, %25 : vector<8x256xf32>
    %27 = vector.extract_strided_slice %26 {offsets = [0, 0], sizes = [8, 128], strides = [1, 1]} : vector<8x256xf32> to vector<8x128xf32>
    %cst_19 = arith.constant 0.000000e+00 : f32
    %28 = vector.broadcast %cst_19 : f32 to vector<8x128xf32>
    %29 = arith.maximumf %27, %28 : vector<8x128xf32>
    %30 = vector.extract_strided_slice %26 {offsets = [0, 128], sizes = [8, 128], strides = [1, 1]} : vector<8x256xf32> to vector<8x128xf32>
    %31 = arith.truncf %29 : vector<8x128xf32> to vector<8x128xbf16>
    %c0_20 = arith.constant 0 : index
    %c0_21 = arith.constant 0 : index
    %32 = vector.load %arg8[%c0_20, %c0_21] : memref<128x128xbf16, #tpu.memory_space<vmem>>, vector<128x128xbf16>
    %cst_22 = arith.constant dense<0.000000e+00> : vector<8x128xf32>
    %33 = tpu.matmul %31, %32, %cst_22 {dimension_numbers = #tpu.dot_dimension_numbers<[1], [0], [0], [1], [0, 0, 1, 1], [], []>} : vector<8x128xbf16>, vector<128x128xbf16>, vector<8x128xf32> -> vector<8x128xf32>
    %c0_23 = arith.constant 0 : index
    %c0_24 = arith.constant 0 : index
    %34 = vector.load %arg9[%c0_23, %c0_24] : memref<1x128xf32, #tpu.memory_space<vmem>>, vector<1x128xf32>
    %35 = vector.broadcast %34 : vector<1x128xf32> to vector<8x128xf32>
    %36 = arith.addf %33, %35 : vector<8x128xf32>
    %37 = arith.addf %36, %30 : vector<8x128xf32>
    %cst_25 = arith.constant 0.000000e+00 : f32
    %38 = vector.broadcast %cst_25 : f32 to vector<8x128xf32>
    %39 = arith.maximumf %37, %38 : vector<8x128xf32>
    %c0_26 = arith.constant 0 : index
    %c128 = arith.constant 128 : index
    %40 = vector.load %arg20[%c0_26, %c128] : memref<8x640xf32, #tpu.memory_space<vmem>>, vector<8x128xf32>
    tpu.vector_store %arg20[%c0_26, %c128], %39 {strides = array<i32>} : memref<8x640xf32, #tpu.memory_space<vmem>>, vector<8x128xf32>,
    %41 = arith.truncf %39 : vector<8x128xf32> to vector<8x128xbf16>
    %c0_27 = arith.constant 0 : index
    %c0_28 = arith.constant 0 : index
    %42 = vector.load %arg10[%c0_27, %c0_28] : memref<128x128xbf16, #tpu.memory_space<vmem>>, vector<128x128xbf16>
    %cst_29 = arith.constant dense<0.000000e+00> : vector<8x128xf32>
    %43 = tpu.matmul %41, %42, %cst_29 {dimension_numbers = #tpu.dot_dimension_numbers<[1], [0], [0], [1], [0, 0, 1, 1], [], []>} : vector<8x128xbf16>, vector<128x128xbf16>, vector<8x128xf32> -> vector<8x128xf32>
    %c0_30 = arith.constant 0 : index
    %c0_31 = arith.constant 0 : index
    %44 = vector.load %arg11[%c0_30, %c0_31] : memref<1x128xf32, #tpu.memory_space<vmem>>, vector<1x128xf32>
    %45 = vector.broadcast %44 : vector<1x128xf32> to vector<8x128xf32>
    %46 = arith.addf %43, %45 : vector<8x128xf32>
    %cst_32 = arith.constant 0.000000e+00 : f32
    %47 = vector.broadcast %cst_32 : f32 to vector<8x128xf32>
    %48 = arith.maximumf %46, %47 : vector<8x128xf32>
    %49 = arith.truncf %48 : vector<8x128xf32> to vector<8x128xbf16>
    %c0_33 = arith.constant 0 : index
    %c0_34 = arith.constant 0 : index
    %50 = vector.load %arg12[%c0_33, %c0_34] : memref<128x128xbf16, #tpu.memory_space<vmem>>, vector<128x128xbf16>
    %cst_35 = arith.constant dense<0.000000e+00> : vector<8x128xf32>
    %51 = tpu.matmul %49, %50, %cst_35 {dimension_numbers = #tpu.dot_dimension_numbers<[1], [0], [0], [1], [0, 0, 1, 1], [], []>} : vector<8x128xbf16>, vector<128x128xbf16>, vector<8x128xf32> -> vector<8x128xf32>
    %c0_36 = arith.constant 0 : index
    %c0_37 = arith.constant 0 : index
    %52 = vector.load %arg13[%c0_36, %c0_37] : memref<1x128xf32, #tpu.memory_space<vmem>>, vector<1x128xf32>
    %53 = vector.broadcast %52 : vector<1x128xf32> to vector<8x128xf32>
    %54 = arith.addf %51, %53 : vector<8x128xf32>
    %55 = arith.addf %54, %39 : vector<8x128xf32>
    %cst_38 = arith.constant 0.000000e+00 : f32
    %56 = vector.broadcast %cst_38 : f32 to vector<8x128xf32>
    %57 = arith.maximumf %55, %56 : vector<8x128xf32>
    %c0_39 = arith.constant 0 : index
    %c256 = arith.constant 256 : index
    %58 = vector.load %arg20[%c0_39, %c256] : memref<8x640xf32, #tpu.memory_space<vmem>>, vector<8x128xf32>
    tpu.vector_store %arg20[%c0_39, %c256], %57 {strides = array<i32>} : memref<8x640xf32, #tpu.memory_space<vmem>>, vector<8x128xf32>,
    %59 = arith.truncf %57 : vector<8x128xf32> to vector<8x128xbf16>
    %c0_40 = arith.constant 0 : index
    %c0_41 = arith.constant 0 : index
    %60 = vector.load %arg14[%c0_40, %c0_41] : memref<128x256xbf16, #tpu.memory_space<vmem>>, vector<128x256xbf16>
    %cst_42 = arith.constant dense<0.000000e+00> : vector<8x256xf32>
    %61 = tpu.matmul %59, %60, %cst_42 {dimension_numbers = #tpu.dot_dimension_numbers<[1], [0], [0], [1], [0, 0, 1, 1], [], []>} : vector<8x128xbf16>, vector<128x256xbf16>, vector<8x256xf32> -> vector<8x256xf32>
    %c0_43 = arith.constant 0 : index
    %c0_44 = arith.constant 0 : index
    %62 = vector.load %arg15[%c0_43, %c0_44] : memref<1x256xf32, #tpu.memory_space<vmem>>, vector<1x256xf32>
    %63 = vector.broadcast %62 : vector<1x256xf32> to vector<8x256xf32>
    %64 = arith.addf %61, %63 : vector<8x256xf32>
    %65 = vector.extract_strided_slice %64 {offsets = [0, 0], sizes = [8, 128], strides = [1, 1]} : vector<8x256xf32> to vector<8x128xf32>
    %cst_45 = arith.constant 0.000000e+00 : f32
    %66 = vector.broadcast %cst_45 : f32 to vector<8x128xf32>
    %67 = arith.maximumf %65, %66 : vector<8x128xf32>
    %68 = vector.extract_strided_slice %64 {offsets = [0, 128], sizes = [8, 128], strides = [1, 1]} : vector<8x256xf32> to vector<8x128xf32>
    %69 = arith.truncf %67 : vector<8x128xf32> to vector<8x128xbf16>
    %c0_46 = arith.constant 0 : index
    %c0_47 = arith.constant 0 : index
    %70 = vector.load %arg16[%c0_46, %c0_47] : memref<128x128xbf16, #tpu.memory_space<vmem>>, vector<128x128xbf16>
    %cst_48 = arith.constant dense<0.000000e+00> : vector<8x128xf32>
    %71 = tpu.matmul %69, %70, %cst_48 {dimension_numbers = #tpu.dot_dimension_numbers<[1], [0], [0], [1], [0, 0, 1, 1], [], []>} : vector<8x128xbf16>, vector<128x128xbf16>, vector<8x128xf32> -> vector<8x128xf32>
    %c0_49 = arith.constant 0 : index
    %c0_50 = arith.constant 0 : index
    %72 = vector.load %arg17[%c0_49, %c0_50] : memref<1x128xf32, #tpu.memory_space<vmem>>, vector<1x128xf32>
    %73 = vector.broadcast %72 : vector<1x128xf32> to vector<8x128xf32>
    %74 = arith.addf %71, %73 : vector<8x128xf32>
    %75 = arith.addf %74, %68 : vector<8x128xf32>
    %cst_51 = arith.constant 0.000000e+00 : f32
    %76 = vector.broadcast %cst_51 : f32 to vector<8x128xf32>
    %77 = arith.maximumf %75, %76 : vector<8x128xf32>
    %c0_52 = arith.constant 0 : index
    %c384 = arith.constant 384 : index
    %78 = vector.load %arg20[%c0_52, %c384] : memref<8x640xf32, #tpu.memory_space<vmem>>, vector<8x128xf32>
    tpu.vector_store %arg20[%c0_52, %c384], %77 {strides = array<i32>} : memref<8x640xf32, #tpu.memory_space<vmem>>, vector<8x128xf32>,
    %79 = arith.truncf %77 : vector<8x128xf32> to vector<8x128xbf16>
    %c0_53 = arith.constant 0 : index
    %c0_54 = arith.constant 0 : index
    %80 = vector.load %arg18[%c0_53, %c0_54] : memref<128x128xbf16, #tpu.memory_space<vmem>>, vector<128x128xbf16>
    %cst_55 = arith.constant dense<0.000000e+00> : vector<8x128xf32>
    %81 = tpu.matmul %79, %80, %cst_55 {dimension_numbers = #tpu.dot_dimension_numbers<[1], [0], [0], [1], [0, 0, 1, 1], [], []>} : vector<8x128xbf16>, vector<128x128xbf16>, vector<8x128xf32> -> vector<8x128xf32>
    %c0_56 = arith.constant 0 : index
    %c0_57 = arith.constant 0 : index
    %82 = vector.load %arg19[%c0_56, %c0_57] : memref<1x128xf32, #tpu.memory_space<vmem>>, vector<1x128xf32>
    %83 = vector.broadcast %82 : vector<1x128xf32> to vector<8x128xf32>
    %84 = arith.addf %81, %83 : vector<8x128xf32>
    %c0_58 = arith.constant 0 : index
    %c512 = arith.constant 512 : index
    %85 = vector.load %arg20[%c0_58, %c512] : memref<8x640xf32, #tpu.memory_space<vmem>>, vector<8x128xf32>
    tpu.vector_store %arg20[%c0_58, %c512], %84 {strides = array<i32>} : memref<8x640xf32, #tpu.memory_space<vmem>>, vector<8x128xf32>,
    return
  }
  func.func @transform_0(%arg0: i32) -> (i32, i32) {
    %c0_i32 = arith.constant 0 : i32
    %c0_i32_0 = arith.constant 0 : i32
    return %arg0, %c0_i32 : i32, i32
  }
  func.func @transform_1(%arg0: i32) -> (i32, i32) {
    %c0_i32 = arith.constant 0 : i32
    %c0_i32_0 = arith.constant 0 : i32
    %c0_i32_1 = arith.constant 0 : i32
    return %c0_i32, %c0_i32_0 : i32, i32
  }
  func.func @transform_2(%arg0: i32) -> (i32, i32) {
    %c0_i32 = arith.constant 0 : i32
    %c0_i32_0 = arith.constant 0 : i32
    %c0_i32_1 = arith.constant 0 : i32
    return %c0_i32, %c0_i32_0 : i32, i32
  }
  func.func @transform_3(%arg0: i32) -> (i32, i32) {
    %c0_i32 = arith.constant 0 : i32
    %c0_i32_0 = arith.constant 0 : i32
    %c0_i32_1 = arith.constant 0 : i32
    return %c0_i32, %c0_i32_0 : i32, i32
  }
  func.func @transform_4(%arg0: i32) -> (i32, i32) {
    %c0_i32 = arith.constant 0 : i32
    %c0_i32_0 = arith.constant 0 : i32
    %c0_i32_1 = arith.constant 0 : i32
    return %c0_i32, %c0_i32_0 : i32, i32
  }
  func.func @transform_5(%arg0: i32) -> (i32, i32) {
    %c0_i32 = arith.constant 0 : i32
    %c0_i32_0 = arith.constant 0 : i32
    %c0_i32_1 = arith.constant 0 : i32
    return %c0_i32, %c0_i32_0 : i32, i32
  }
  func.func @transform_6(%arg0: i32) -> (i32, i32) {
    %c0_i32 = arith.constant 0 : i32
    %c0_i32_0 = arith.constant 0 : i32
    %c0_i32_1 = arith.constant 0 : i32
    return %c0_i32, %c0_i32_0 : i32, i32
  }
  func.func @transform_7(%arg0: i32) -> (i32, i32) {
    %c0_i32 = arith.constant 0 : i32
    %c0_i32_0 = arith.constant 0 : i32
    %c0_i32_1 = arith.constant 0 : i32
    return %c0_i32, %c0_i32_0 : i32, i32
  }
  func.func @transform_8(%arg0: i32) -> (i32, i32) {
    %c0_i32 = arith.constant 0 : i32
    %c0_i32_0 = arith.constant 0 : i32
    %c0_i32_1 = arith.constant 0 : i32
    return %c0_i32, %c0_i32_0 : i32, i32
  }
  func.func @transform_9(%arg0: i32) -> (i32, i32) {
    %c0_i32 = arith.constant 0 : i32
    %c0_i32_0 = arith.constant 0 : i32
    %c0_i32_1 = arith.constant 0 : i32
    return %c0_i32, %c0_i32_0 : i32, i32
  }
  func.func @transform_10(%arg0: i32) -> (i32, i32) {
    %c0_i32 = arith.constant 0 : i32
    %c0_i32_0 = arith.constant 0 : i32
    %c0_i32_1 = arith.constant 0 : i32
    return %c0_i32, %c0_i32_0 : i32, i32
  }
  func.func @transform_11(%arg0: i32) -> (i32, i32) {
    %c0_i32 = arith.constant 0 : i32
    %c0_i32_0 = arith.constant 0 : i32
    %c0_i32_1 = arith.constant 0 : i32
    return %c0_i32, %c0_i32_0 : i32, i32
  }
  func.func @transform_12(%arg0: i32) -> (i32, i32) {
    %c0_i32 = arith.constant 0 : i32
    %c0_i32_0 = arith.constant 0 : i32
    %c0_i32_1 = arith.constant 0 : i32
    return %c0_i32, %c0_i32_0 : i32, i32
  }
  func.func @transform_13(%arg0: i32) -> (i32, i32) {
    %c0_i32 = arith.constant 0 : i32
    %c0_i32_0 = arith.constant 0 : i32
    %c0_i32_1 = arith.constant 0 : i32
    return %c0_i32, %c0_i32_0 : i32, i32
  }
  func.func @transform_14(%arg0: i32) -> (i32, i32) {
    %c0_i32 = arith.constant 0 : i32
    %c0_i32_0 = arith.constant 0 : i32
    %c0_i32_1 = arith.constant 0 : i32
    return %c0_i32, %c0_i32_0 : i32, i32
  }
  func.func @transform_15(%arg0: i32) -> (i32, i32) {
    %c0_i32 = arith.constant 0 : i32
    %c0_i32_0 = arith.constant 0 : i32
    %c0_i32_1 = arith.constant 0 : i32
    return %c0_i32, %c0_i32_0 : i32, i32
  }
  func.func @transform_16(%arg0: i32) -> (i32, i32) {
    %c0_i32 = arith.constant 0 : i32
    %c0_i32_0 = arith.constant 0 : i32
    %c0_i32_1 = arith.constant 0 : i32
    return %c0_i32, %c0_i32_0 : i32, i32
  }
  func.func @transform_17(%arg0: i32) -> (i32, i32) {
    %c0_i32 = arith.constant 0 : i32
    %c0_i32_0 = arith.constant 0 : i32
    %c0_i32_1 = arith.constant 0 : i32
    return %c0_i32, %c0_i32_0 : i32, i32
  }
  func.func @transform_18(%arg0: i32) -> (i32, i32) {
    %c0_i32 = arith.constant 0 : i32
    %c0_i32_0 = arith.constant 0 : i32
    %c0_i32_1 = arith.constant 0 : i32
    return %c0_i32, %c0_i32_0 : i32, i32
  }
  func.func @transform_19(%arg0: i32) -> (i32, i32) {
    %c0_i32 = arith.constant 0 : i32
    %c0_i32_0 = arith.constant 0 : i32
    return %arg0, %c0_i32 : i32, i32
  }
}

module attributes {stable_mosaic.version = 11 : i64} {
  func.func @kernel(%arg0: i32, %arg1: memref<8x128xf32, #tpu.memory_space<vmem>>, %arg2: memref<128x256xbf16, #tpu.memory_space<vmem>>, %arg3: memref<1x256xf32, #tpu.memory_space<vmem>>, %arg4: memref<128x128xbf16, #tpu.memory_space<vmem>>, %arg5: memref<1x128xf32, #tpu.memory_space<vmem>>, %arg6: memref<128x256xbf16, #tpu.memory_space<vmem>>, %arg7: memref<1x256xf32, #tpu.memory_space<vmem>>, %arg8: memref<128x128xbf16, #tpu.memory_space<vmem>>, %arg9: memref<1x128xf32, #tpu.memory_space<vmem>>, %arg10: memref<128x128xbf16, #tpu.memory_space<vmem>>, %arg11: memref<1x128xf32, #tpu.memory_space<vmem>>, %arg12: memref<128x128xbf16, #tpu.memory_space<vmem>>, %arg13: memref<1x128xf32, #tpu.memory_space<vmem>>, %arg14: memref<128x256xbf16, #tpu.memory_space<vmem>>, %arg15: memref<1x256xf32, #tpu.memory_space<vmem>>, %arg16: memref<128x128xbf16, #tpu.memory_space<vmem>>, %arg17: memref<1x128xf32, #tpu.memory_space<vmem>>, %arg18: memref<128x128xbf16, #tpu.memory_space<vmem>>, %arg19: memref<1x128xf32, #tpu.memory_space<vmem>>, %arg20: memref<8x640xf32, #tpu.memory_space<vmem>>) attributes {dimension_semantics = [#tpu.dimension_semantics<parallel>], iteration_bounds = array<i64: 1>, scalar_prefetch = 0 : i64, scratch_operands = 0 : i64, tpu.core_type = #tpu.core_type<tc>, window_params = [{transform_indices = @transform_0, window_bounds = array<i64: 8, 128>}, {pipeline_mode = #tpu.pipeline_mode<synchronous>, transform_indices = @transform_1, window_bounds = array<i64: 128, 256>}, {pipeline_mode = #tpu.pipeline_mode<synchronous>, transform_indices = @transform_2, window_bounds = array<i64: 1, 256>}, {pipeline_mode = #tpu.pipeline_mode<synchronous>, transform_indices = @transform_3, window_bounds = array<i64: 128, 128>}, {pipeline_mode = #tpu.pipeline_mode<synchronous>, transform_indices = @transform_4, window_bounds = array<i64: 1, 128>}, {pipeline_mode = #tpu.pipeline_mode<synchronous>, transform_indices = @transform_5, window_bounds = array<i64: 128, 256>}, {pipeline_mode = #tpu.pipeline_mode<synchronous>, transform_indices = @transform_6, window_bounds = array<i64: 1, 256>}, {pipeline_mode = #tpu.pipeline_mode<synchronous>, transform_indices = @transform_7, window_bounds = array<i64: 128, 128>}, {pipeline_mode = #tpu.pipeline_mode<synchronous>, transform_indices = @transform_8, window_bounds = array<i64: 1, 128>}, {pipeline_mode = #tpu.pipeline_mode<synchronous>, transform_indices = @transform_9, window_bounds = array<i64: 128, 128>}, {pipeline_mode = #tpu.pipeline_mode<synchronous>, transform_indices = @transform_10, window_bounds = array<i64: 1, 128>}, {pipeline_mode = #tpu.pipeline_mode<synchronous>, transform_indices = @transform_11, window_bounds = array<i64: 128, 128>}, {pipeline_mode = #tpu.pipeline_mode<synchronous>, transform_indices = @transform_12, window_bounds = array<i64: 1, 128>}, {pipeline_mode = #tpu.pipeline_mode<synchronous>, transform_indices = @transform_13, window_bounds = array<i64: 128, 256>}, {pipeline_mode = #tpu.pipeline_mode<synchronous>, transform_indices = @transform_14, window_bounds = array<i64: 1, 256>}, {pipeline_mode = #tpu.pipeline_mode<synchronous>, transform_indices = @transform_15, window_bounds = array<i64: 128, 128>}, {pipeline_mode = #tpu.pipeline_mode<synchronous>, transform_indices = @transform_16, window_bounds = array<i64: 1, 128>}, {pipeline_mode = #tpu.pipeline_mode<synchronous>, transform_indices = @transform_17, window_bounds = array<i64: 128, 128>}, {pipeline_mode = #tpu.pipeline_mode<synchronous>, transform_indices = @transform_18, window_bounds = array<i64: 1, 128>}, {transform_indices = @transform_19, window_bounds = array<i64: 8, 640>}]} {
    %c0 = arith.constant 0 : index
    %c0_0 = arith.constant 0 : index
    %0 = vector.load %arg1[%c0, %c0_0] : memref<8x128xf32, #tpu.memory_space<vmem>>, vector<8x128xf32>
    %1 = arith.truncf %0 : vector<8x128xf32> to vector<8x128xbf16>
    %c0_1 = arith.constant 0 : index
    %c0_2 = arith.constant 0 : index
    %2 = vector.load %arg2[%c0_1, %c0_2] : memref<128x256xbf16, #tpu.memory_space<vmem>>, vector<128x256xbf16>
    %cst = arith.constant dense<0.000000e+00> : vector<8x256xf32>
    %3 = tpu.matmul %1, %2, %cst {dimension_numbers = #tpu.dot_dimension_numbers<[1], [0], [0], [1], [0, 0, 1, 1], [], []>} : vector<8x128xbf16>, vector<128x256xbf16>, vector<8x256xf32> -> vector<8x256xf32>
    %c0_3 = arith.constant 0 : index
    %c0_4 = arith.constant 0 : index
    %4 = vector.load %arg3[%c0_3, %c0_4] : memref<1x256xf32, #tpu.memory_space<vmem>>, vector<1x256xf32>
    %5 = vector.broadcast %4 : vector<1x256xf32> to vector<8x256xf32>
    %6 = arith.addf %3, %5 : vector<8x256xf32>
    %7 = vector.extract_strided_slice %6 {offsets = [0, 0], sizes = [8, 128], strides = [1, 1]} : vector<8x256xf32> to vector<8x128xf32>
    %cst_5 = arith.constant 0.000000e+00 : f32
    %8 = vector.broadcast %cst_5 : f32 to vector<8x128xf32>
    %9 = arith.maximumf %7, %8 : vector<8x128xf32>
    %10 = vector.extract_strided_slice %6 {offsets = [0, 128], sizes = [8, 128], strides = [1, 1]} : vector<8x256xf32> to vector<8x128xf32>
    %11 = arith.truncf %9 : vector<8x128xf32> to vector<8x128xbf16>
    %c0_6 = arith.constant 0 : index
    %c0_7 = arith.constant 0 : index
    %12 = vector.load %arg4[%c0_6, %c0_7] : memref<128x128xbf16, #tpu.memory_space<vmem>>, vector<128x128xbf16>
    %cst_8 = arith.constant dense<0.000000e+00> : vector<8x128xf32>
    %13 = tpu.matmul %11, %12, %cst_8 {dimension_numbers = #tpu.dot_dimension_numbers<[1], [0], [0], [1], [0, 0, 1, 1], [], []>} : vector<8x128xbf16>, vector<128x128xbf16>, vector<8x128xf32> -> vector<8x128xf32>
    %c0_9 = arith.constant 0 : index
    %c0_10 = arith.constant 0 : index
    %14 = vector.load %arg5[%c0_9, %c0_10] : memref<1x128xf32, #tpu.memory_space<vmem>>, vector<1x128xf32>
    %15 = vector.broadcast %14 : vector<1x128xf32> to vector<8x128xf32>
    %16 = arith.addf %13, %15 : vector<8x128xf32>
    %17 = arith.addf %16, %10 : vector<8x128xf32>
    %cst_11 = arith.constant 0.000000e+00 : f32
    %18 = vector.broadcast %cst_11 : f32 to vector<8x128xf32>
    %19 = arith.maximumf %17, %18 : vector<8x128xf32>
    %c0_12 = arith.constant 0 : index
    %c0_13 = arith.constant 0 : index
    %20 = vector.load %arg20[%c0_12, %c0_13] : memref<8x640xf32, #tpu.memory_space<vmem>>, vector<8x128xf32>
    tpu.vector_store %arg20[%c0_12, %c0_13], %19 {strides = array<i32>} : memref<8x640xf32, #tpu.memory_space<vmem>>, vector<8x128xf32>,
    %21 = arith.truncf %19 : vector<8x128xf32> to vector<8x128xbf16>
    %c0_14 = arith.constant 0 : index
    %c0_15 = arith.constant 0 : index
    %22 = vector.load %arg6[%c0_14, %c0_15] : memref<128x256xbf16, #tpu.memory_space<vmem>>, vector<128x256xbf16>
    %cst_16 = arith.constant dense<0.000000e+00> : vector<8x256xf32>
    %23 = tpu.matmul %21, %22, %cst_16 {dimension_numbers = #tpu.dot_dimension_numbers<[1], [0], [0], [1], [0, 0, 1, 1], [], []>} : vector<8x128xbf16>, vector<128x256xbf16>, vector<8x256xf32> -> vector<8x256xf32>
    %c0_17 = arith.constant 0 : index
    %c0_18 = arith.constant 0 : index
    %24 = vector.load %arg7[%c0_17, %c0_18] : memref<1x256xf32, #tpu.memory_space<vmem>>, vector<1x256xf32>
    %25 = vector.broadcast %24 : vector<1x256xf32> to vector<8x256xf32>
    %26 = arith.addf %23, %25 : vector<8x256xf32>
    %27 = vector.extract_strided_slice %26 {offsets = [0, 0], sizes = [8, 128], strides = [1, 1]} : vector<8x256xf32> to vector<8x128xf32>
    %cst_19 = arith.constant 0.000000e+00 : f32
    %28 = vector.broadcast %cst_19 : f32 to vector<8x128xf32>
    %29 = arith.maximumf %27, %28 : vector<8x128xf32>
    %30 = vector.extract_strided_slice %26 {offsets = [0, 128], sizes = [8, 128], strides = [1, 1]} : vector<8x256xf32> to vector<8x128xf32>
    %31 = arith.truncf %29 : vector<8x128xf32> to vector<8x128xbf16>
    %c0_20 = arith.constant 0 : index
    %c0_21 = arith.constant 0 : index
    %32 = vector.load %arg8[%c0_20, %c0_21] : memref<128x128xbf16, #tpu.memory_space<vmem>>, vector<128x128xbf16>
    %cst_22 = arith.constant dense<0.000000e+00> : vector<8x128xf32>
    %33 = tpu.matmul %31, %32, %cst_22 {dimension_numbers = #tpu.dot_dimension_numbers<[1], [0], [0], [1], [0, 0, 1, 1], [], []>} : vector<8x128xbf16>, vector<128x128xbf16>, vector<8x128xf32> -> vector<8x128xf32>
    %c0_23 = arith.constant 0 : index
    %c0_24 = arith.constant 0 : index
    %34 = vector.load %arg9[%c0_23, %c0_24] : memref<1x128xf32, #tpu.memory_space<vmem>>, vector<1x128xf32>
    %35 = vector.broadcast %34 : vector<1x128xf32> to vector<8x128xf32>
    %36 = arith.addf %33, %35 : vector<8x128xf32>
    %37 = arith.addf %36, %30 : vector<8x128xf32>
    %cst_25 = arith.constant 0.000000e+00 : f32
    %38 = vector.broadcast %cst_25 : f32 to vector<8x128xf32>
    %39 = arith.maximumf %37, %38 : vector<8x128xf32>
    %c0_26 = arith.constant 0 : index
    %c128 = arith.constant 128 : index
    %40 = vector.load %arg20[%c0_26, %c128] : memref<8x640xf32, #tpu.memory_space<vmem>>, vector<8x128xf32>
    tpu.vector_store %arg20[%c0_26, %c128], %39 {strides = array<i32>} : memref<8x640xf32, #tpu.memory_space<vmem>>, vector<8x128xf32>,
    %41 = arith.truncf %39 : vector<8x128xf32> to vector<8x128xbf16>
    %c0_27 = arith.constant 0 : index
    %c0_28 = arith.constant 0 : index
    %42 = vector.load %arg10[%c0_27, %c0_28] : memref<128x128xbf16, #tpu.memory_space<vmem>>, vector<128x128xbf16>
    %cst_29 = arith.constant dense<0.000000e+00> : vector<8x128xf32>
    %43 = tpu.matmul %41, %42, %cst_29 {dimension_numbers = #tpu.dot_dimension_numbers<[1], [0], [0], [1], [0, 0, 1, 1], [], []>} : vector<8x128xbf16>, vector<128x128xbf16>, vector<8x128xf32> -> vector<8x128xf32>
    %c0_30 = arith.constant 0 : index
    %c0_31 = arith.constant 0 : index
    %44 = vector.load %arg11[%c0_30, %c0_31] : memref<1x128xf32, #tpu.memory_space<vmem>>, vector<1x128xf32>
    %45 = vector.broadcast %44 : vector<1x128xf32> to vector<8x128xf32>
    %46 = arith.addf %43, %45 : vector<8x128xf32>
    %cst_32 = arith.constant 0.000000e+00 : f32
    %47 = vector.broadcast %cst_32 : f32 to vector<8x128xf32>
    %48 = arith.maximumf %46, %47 : vector<8x128xf32>
    %49 = arith.truncf %48 : vector<8x128xf32> to vector<8x128xbf16>
    %c0_33 = arith.constant 0 : index
    %c0_34 = arith.constant 0 : index
    %50 = vector.load %arg12[%c0_33, %c0_34] : memref<128x128xbf16, #tpu.memory_space<vmem>>, vector<128x128xbf16>
    %cst_35 = arith.constant dense<0.000000e+00> : vector<8x128xf32>
    %51 = tpu.matmul %49, %50, %cst_35 {dimension_numbers = #tpu.dot_dimension_numbers<[1], [0], [0], [1], [0, 0, 1, 1], [], []>} : vector<8x128xbf16>, vector<128x128xbf16>, vector<8x128xf32> -> vector<8x128xf32>
    %c0_36 = arith.constant 0 : index
    %c0_37 = arith.constant 0 : index
    %52 = vector.load %arg13[%c0_36, %c0_37] : memref<1x128xf32, #tpu.memory_space<vmem>>, vector<1x128xf32>
    %53 = vector.broadcast %52 : vector<1x128xf32> to vector<8x128xf32>
    %54 = arith.addf %51, %53 : vector<8x128xf32>
    %55 = arith.addf %54, %39 : vector<8x128xf32>
    %cst_38 = arith.constant 0.000000e+00 : f32
    %56 = vector.broadcast %cst_38 : f32 to vector<8x128xf32>
    %57 = arith.maximumf %55, %56 : vector<8x128xf32>
    %c0_39 = arith.constant 0 : index
    %c256 = arith.constant 256 : index
    %58 = vector.load %arg20[%c0_39, %c256] : memref<8x640xf32, #tpu.memory_space<vmem>>, vector<8x128xf32>
    tpu.vector_store %arg20[%c0_39, %c256], %57 {strides = array<i32>} : memref<8x640xf32, #tpu.memory_space<vmem>>, vector<8x128xf32>,
    %59 = arith.truncf %57 : vector<8x128xf32> to vector<8x128xbf16>
    %c0_40 = arith.constant 0 : index
    %c0_41 = arith.constant 0 : index
    %60 = vector.load %arg14[%c0_40, %c0_41] : memref<128x256xbf16, #tpu.memory_space<vmem>>, vector<128x256xbf16>
    %cst_42 = arith.constant dense<0.000000e+00> : vector<8x256xf32>
    %61 = tpu.matmul %59, %60, %cst_42 {dimension_numbers = #tpu.dot_dimension_numbers<[1], [0], [0], [1], [0, 0, 1, 1], [], []>} : vector<8x128xbf16>, vector<128x256xbf16>, vector<8x256xf32> -> vector<8x256xf32>
    %c0_43 = arith.constant 0 : index
    %c0_44 = arith.constant 0 : index
    %62 = vector.load %arg15[%c0_43, %c0_44] : memref<1x256xf32, #tpu.memory_space<vmem>>, vector<1x256xf32>
    %63 = vector.broadcast %62 : vector<1x256xf32> to vector<8x256xf32>
    %64 = arith.addf %61, %63 : vector<8x256xf32>
    %65 = vector.extract_strided_slice %64 {offsets = [0, 0], sizes = [8, 128], strides = [1, 1]} : vector<8x256xf32> to vector<8x128xf32>
    %cst_45 = arith.constant 0.000000e+00 : f32
    %66 = vector.broadcast %cst_45 : f32 to vector<8x128xf32>
    %67 = arith.maximumf %65, %66 : vector<8x128xf32>
    %68 = vector.extract_strided_slice %64 {offsets = [0, 128], sizes = [8, 128], strides = [1, 1]} : vector<8x256xf32> to vector<8x128xf32>
    %69 = arith.truncf %67 : vector<8x128xf32> to vector<8x128xbf16>
    %c0_46 = arith.constant 0 : index
    %c0_47 = arith.constant 0 : index
    %70 = vector.load %arg16[%c0_46, %c0_47] : memref<128x128xbf16, #tpu.memory_space<vmem>>, vector<128x128xbf16>
    %cst_48 = arith.constant dense<0.000000e+00> : vector<8x128xf32>
    %71 = tpu.matmul %69, %70, %cst_48 {dimension_numbers = #tpu.dot_dimension_numbers<[1], [0], [0], [1], [0, 0, 1, 1], [], []>} : vector<8x128xbf16>, vector<128x128xbf16>, vector<8x128xf32> -> vector<8x128xf32>
    %c0_49 = arith.constant 0 : index
    %c0_50 = arith.constant 0 : index
    %72 = vector.load %arg17[%c0_49, %c0_50] : memref<1x128xf32, #tpu.memory_space<vmem>>, vector<1x128xf32>
    %73 = vector.broadcast %72 : vector<1x128xf32> to vector<8x128xf32>
    %74 = arith.addf %71, %73 : vector<8x128xf32>
    %75 = arith.addf %74, %68 : vector<8x128xf32>
    %cst_51 = arith.constant 0.000000e+00 : f32
    %76 = vector.broadcast %cst_51 : f32 to vector<8x128xf32>
    %77 = arith.maximumf %75, %76 : vector<8x128xf32>
    %c0_52 = arith.constant 0 : index
    %c384 = arith.constant 384 : index
    %78 = vector.load %arg20[%c0_52, %c384] : memref<8x640xf32, #tpu.memory_space<vmem>>, vector<8x128xf32>
    tpu.vector_store %arg20[%c0_52, %c384], %77 {strides = array<i32>} : memref<8x640xf32, #tpu.memory_space<vmem>>, vector<8x128xf32>,
    %79 = arith.truncf %77 : vector<8x128xf32> to vector<8x128xbf16>
    %c0_53 = arith.constant 0 : index
    %c0_54 = arith.constant 0 : index
    %80 = vector.load %arg18[%c0_53, %c0_54] : memref<128x128xbf16, #tpu.memory_space<vmem>>, vector<128x128xbf16>
    %cst_55 = arith.constant dense<0.000000e+00> : vector<8x128xf32>
    %81 = tpu.matmul %79, %80, %cst_55 {dimension_numbers = #tpu.dot_dimension_numbers<[1], [0], [0], [1], [0, 0, 1, 1], [], []>} : vector<8x128xbf16>, vector<128x128xbf16>, vector<8x128xf32> -> vector<8x128xf32>
    %c0_56 = arith.constant 0 : index
    %c0_57 = arith.constant 0 : index
    %82 = vector.load %arg19[%c0_56, %c0_57] : memref<1x128xf32, #tpu.memory_space<vmem>>, vector<1x128xf32>
    %83 = vector.broadcast %82 : vector<1x128xf32> to vector<8x128xf32>
    %84 = arith.addf %81, %83 : vector<8x128xf32>
    %c0_58 = arith.constant 0 : index
    %c512 = arith.constant 512 : index
    %85 = vector.load %arg20[%c0_58, %c512] : memref<8x640xf32, #tpu.memory_space<vmem>>, vector<8x128xf32>
    tpu.vector_store %arg20[%c0_58, %c512], %84 {strides = array<i32>} : memref<8x640xf32, #tpu.memory_space<vmem>>, vector<8x128xf32>,
    return
  }
  func.func @transform_0(%arg0: i32) -> (i32, i32) {
    %c0_i32 = arith.constant 0 : i32
    %c0_i32_0 = arith.constant 0 : i32
    return %arg0, %c0_i32 : i32, i32
  }
  func.func @transform_1(%arg0: i32) -> (i32, i32) {
    %c0_i32 = arith.constant 0 : i32
    %c0_i32_0 = arith.constant 0 : i32
    %c0_i32_1 = arith.constant 0 : i32
    return %c0_i32, %c0_i32_0 : i32, i32
  }
  func.func @transform_2(%arg0: i32) -> (i32, i32) {
    %c0_i32 = arith.constant 0 : i32
    %c0_i32_0 = arith.constant 0 : i32
    %c0_i32_1 = arith.constant 0 : i32
    return %c0_i32, %c0_i32_0 : i32, i32
  }
  func.func @transform_3(%arg0: i32) -> (i32, i32) {
    %c0_i32 = arith.constant 0 : i32
    %c0_i32_0 = arith.constant 0 : i32
    %c0_i32_1 = arith.constant 0 : i32
    return %c0_i32, %c0_i32_0 : i32, i32
  }
  func.func @transform_4(%arg0: i32) -> (i32, i32) {
    %c0_i32 = arith.constant 0 : i32
    %c0_i32_0 = arith.constant 0 : i32
    %c0_i32_1 = arith.constant 0 : i32
    return %c0_i32, %c0_i32_0 : i32, i32
  }
  func.func @transform_5(%arg0: i32) -> (i32, i32) {
    %c0_i32 = arith.constant 0 : i32
    %c0_i32_0 = arith.constant 0 : i32
    %c0_i32_1 = arith.constant 0 : i32
    return %c0_i32, %c0_i32_0 : i32, i32
  }
  func.func @transform_6(%arg0: i32) -> (i32, i32) {
    %c0_i32 = arith.constant 0 : i32
    %c0_i32_0 = arith.constant 0 : i32
    %c0_i32_1 = arith.constant 0 : i32
    return %c0_i32, %c0_i32_0 : i32, i32
  }
  func.func @transform_7(%arg0: i32) -> (i32, i32) {
    %c0_i32 = arith.constant 0 : i32
    %c0_i32_0 = arith.constant 0 : i32
    %c0_i32_1 = arith.constant 0 : i32
    return %c0_i32, %c0_i32_0 : i32, i32
  }
  func.func @transform_8(%arg0: i32) -> (i32, i32) {
    %c0_i32 = arith.constant 0 : i32
    %c0_i32_0 = arith.constant 0 : i32
    %c0_i32_1 = arith.constant 0 : i32
    return %c0_i32, %c0_i32_0 : i32, i32
  }
  func.func @transform_9(%arg0: i32) -> (i32, i32) {
    %c0_i32 = arith.constant 0 : i32
    %c0_i32_0 = arith.constant 0 : i32
    %c0_i32_1 = arith.constant 0 : i32
    return %c0_i32, %c0_i32_0 : i32, i32
  }
  func.func @transform_10(%arg0: i32) -> (i32, i32) {
    %c0_i32 = arith.constant 0 : i32
    %c0_i32_0 = arith.constant 0 : i32
    %c0_i32_1 = arith.constant 0 : i32
    return %c0_i32, %c0_i32_0 : i32, i32
  }
  func.func @transform_11(%arg0: i32) -> (i32, i32) {
    %c0_i32 = arith.constant 0 : i32
    %c0_i32_0 = arith.constant 0 : i32
    %c0_i32_1 = arith.constant 0 : i32
    return %c0_i32, %c0_i32_0 : i32, i32
  }
  func.func @transform_12(%arg0: i32) -> (i32, i32) {
    %c0_i32 = arith.constant 0 : i32
    %c0_i32_0 = arith.constant 0 : i32
    %c0_i32_1 = arith.constant 0 : i32
    return %c0_i32, %c0_i32_0 : i32, i32
  }
  func.func @transform_13(%arg0: i32) -> (i32, i32) {
    %c0_i32 = arith.constant 0 : i32
    %c0_i32_0 = arith.constant 0 : i32
    %c0_i32_1 = arith.constant 0 : i32
    return %c0_i32, %c0_i32_0 : i32, i32
  }
  func.func @transform_14(%arg0: i32) -> (i32, i32) {
    %c0_i32 = arith.constant 0 : i32
    %c0_i32_0 = arith.constant 0 : i32
    %c0_i32_1 = arith.constant 0 : i32
    return %c0_i32, %c0_i32_0 : i32, i32
  }
  func.func @transform_15(%arg0: i32) -> (i32, i32) {
    %c0_i32 = arith.constant 0 : i32
    %c0_i32_0 = arith.constant 0 : i32
    %c0_i32_1 = arith.constant 0 : i32
    return %c0_i32, %c0_i32_0 : i32, i32
  }
  func.func @transform_16(%arg0: i32) -> (i32, i32) {
    %c0_i32 = arith.constant 0 : i32
    %c0_i32_0 = arith.constant 0 : i32
    %c0_i32_1 = arith.constant 0 : i32
    return %c0_i32, %c0_i32_0 : i32, i32
  }
  func.func @transform_17(%arg0: i32) -> (i32, i32) {
    %c0_i32 = arith.constant 0 : i32
    %c0_i32_0 = arith.constant 0 : i32
    %c0_i32_1 = arith.constant 0 : i32
    return %c0_i32, %c0_i32_0 : i32, i32
  }
  func.func @transform_18(%arg0: i32) -> (i32, i32) {
    %c0_i32 = arith.constant 0 : i32
    %c0_i32_0 = arith.constant 0 : i32
    %c0_i32_1 = arith.constant 0 : i32
    return %c0_i32, %c0_i32_0 : i32, i32
  }
  func.func @transform_19(%arg0: i32) -> (i32, i32) {
    %c0_i32 = arith.constant 0 : i32
    %c0_i32_0 = arith.constant 0 : i32
    return %arg0, %c0_i32 : i32, i32
  }
}

</mosaic_0001>

<bundles_post_ra>
// kernel: tpu_custom_call.1
= control target key start
LH: loop header
LB: loop body
LE: loop exit
PB: predicated region body
PF: predicated region fallthrough
CT: control target
= control target key end

     0   :  { %s2290_s0 = inlined_call_operand.hbm [shape: f32[8,128], index: 0, kind: input, shape index: {}]   ;;  %s2291_s1 = inlined_call_operand.hbm [shape: bf16[128,256], index: 1, kind: input, shape index: {}]   ;;  %s2292_s2 = inlined_call_operand.vmem [shape: f32[1,256], index: 2, kind: input, shape index: {}]   ;;  %s2293_s3 = inlined_call_operand.hbm [shape: bf16[128,128], index: 3, kind: input, shape index: {}]   ;;  %s2294_s4 = inlined_call_operand.vmem [shape: f32[1,128], index: 4, kind: input, shape index: {}]   ;;  %s2295_s5 = inlined_call_operand.hbm [shape: bf16[128,256], index: 5, kind: input, shape index: {}]   ;;  %s2296_s6 = inlined_call_operand.vmem [shape: f32[1,256], index: 6, kind: input, shape index: {}]   ;;  %s2297_s7 = inlined_call_operand.hbm [shape: bf16[128,128], index: 7, kind: input, shape index: {}]   ;;  %s2298_s8 = inlined_call_operand.vmem [shape: f32[1,128], index: 8, kind: input, shape index: {}]   ;;  %s2299_s9 = inlined_call_operand.hbm [shape: bf16[128,128], index: 9, kind: input, shape index: {}]   ;;  %s2300_s10 = inlined_call_operand.vmem [shape: f32[1,128], index: 10, kind: input, shape index: {}]   ;;  %s2301_s11 = inlined_call_operand.hbm [shape: bf16[128,128], index: 11, kind: input, shape index: {}]   ;;  %s2302_s12 = inlined_call_operand.vmem [shape: f32[1,128], index: 12, kind: input, shape index: {}]   ;;  %s2303_s13 = inlined_call_operand.hbm [shape: bf16[128,256], index: 13, kind: input, shape index: {}]   ;;  %s2304_s14 = inlined_call_operand.vmem [shape: f32[1,256], index: 14, kind: input, shape index: {}]   ;;  %s2305_s15 = inlined_call_operand.hbm [shape: bf16[128,128], index: 15, kind: input, shape index: {}]   ;;  %s2306_s16 = inlined_call_operand.vmem [shape: f32[1,128], index: 16, kind: input, shape index: {}]   ;;  %s2307_s17 = inlined_call_operand.hbm [shape: bf16[128,128], index: 17, kind: input, shape index: {}]   ;;  %s2308_s18 = inlined_call_operand.vmem [shape: f32[1,128], index: 18, kind: input, shape index: {}]   ;;  %s2309_s19 = inlined_call_operand.hbm [shape: f32[8,640], index: 19, kind: output, shape index: {}]  }
   0x1   :  { %2310 = sst [smem:[#allocation27_spill]] %s2290_s0 }
   0x2   :  { %2311 = sst [smem:[#allocation28_spill]] %s2291_s1 }
   0x3   :  { %2312 = sst [smem:[#allocation29_spill]] %s2292_s2 }
   0x4   :  { %2313 = sst [smem:[#allocation30_spill]] %s2293_s3 }
   0x5   :  { %24 = vsyncpa [#allocation3], 0 }
   0x6   :  { %25 = vsyncpa [#allocation6], 0 }
   0x7   :  { %26 = vsyncpa [#allocation9], 0 }
   0x8   :  { %27 = vsyncpa [#allocation12], 0 }
   0x9   :  { %28 = vsyncpa [#allocation15], 0 }
   0xa   :  { %29 = vsyncpa [#allocation18], 0 }
   0xb   :  { %30 = vsyncpa [#allocation4], 0  ;;  %s2006_s0 = smov [#allocation5]  }
   0xc   :  { %s46_s30 = sshll.u32 %s2006_s0, 4  ;;  %s47_s30 = int_to_ptr.vmem [resolvable:$true] %s46_s30 }
   0xd   :  { %s1780_s20 = scalar_lea.vmem %s47_s30, 2048  ;;  %p1785_p1 = scmp.lt.s32.totalorder %s47_s30, %s47_s30 }
   0xe   :  { %p1781_p0 = scmp.ne.s32.totalorder %s47_s30, %s1780_s20  ;;  %p1786_p2 = scmp.lt.s32.totalorder %s1780_s20, %s1780_s20 }
  0x10   :  { %p1787_p3 = por %p1786_p2, %p1785_p1 }
  0x12   :  { %p1788_p4 = pnand %p1787_p3, %p1781_p0 }
  0x14   :  { %1791 = shalt.err (!%p1788_p4)
}
  0x15   :  { %s2007_s21 = smov 128   ;;  %s2008_s1 = smov 8  }
  0x16   :  { %s2314_s23 = sld [smem:[#allocation28_spill]]  ;;  %s2009_s24 = smov [#allocation8]  }
  0x17   :  { %s74_s25 = sshll.u32 %s2009_s24, 4  ;;  %s75_s25 = int_to_ptr.vmem [resolvable:$true] %s74_s25 }
  0x18   :  { %s1800_s3 = scalar_lea.vmem %s75_s25, 2048  ;;  %p1805_p6 = scmp.lt.s32.totalorder %s75_s25, %s75_s25 }
  0x19   :  { %p1801_p5 = scmp.ne.s32.totalorder %s75_s25, %s1800_s3  ;;  %p1806_p7 = scmp.lt.s32.totalorder %s1800_s3, %s1800_s3 }
  0x1b   :  { %p1807_p8 = por %p1806_p7, %p1805_p6 }
  0x1c   :  { %52 = dma.hbm_to_vmem [thread:$0]  %s2314_s23, 2048, %s47_s30, [#allocation6], %s2007_s21, %s2007_s21, %s2008_s1  }
  0x1d   :  { %p1808_p9 = pnand %p1807_p8, %p1801_p5 }
  0x1f   :  { %1811 = shalt.err (!%p1808_p9)
}
  0x20   :  { %80 = dma.hbm_to_vmem [thread:$0]  %s2295_s5, 2048, %s75_s25, [#allocation9], %s2007_s21, %s2007_s21, %s2008_s1  }
  0x21   :  { %s2010_s28 = smov [#allocation11]   ;;  %s2011_s0 = smov [#allocation14]  }
  0x22   :  { %s102_s29 = sshll.u32 %s2010_s28, 4  ;;  %s130_s30 = sshll.u32 %s2011_s0, 4  ;;  %s103_s29 = int_to_ptr.vmem [resolvable:$true] %s102_s29  ;;  %s131_s30 = int_to_ptr.vmem [resolvable:$true] %s130_s30 }
  0x23   :  { %s1820_s20 = scalar_lea.vmem %s103_s29, 1024  ;;  %p1825_p11 = scmp.lt.s32.totalorder %s103_s29, %s103_s29 }
  0x24   :  { %p1821_p10 = scmp.ne.s32.totalorder %s103_s29, %s1820_s20  ;;  %p1826_p12 = scmp.lt.s32.totalorder %s1820_s20, %s1820_s20 }
  0x26   :  { %p1827_p13 = por %p1826_p12, %p1825_p11 }
  0x28   :  { %p1828_p0 = pnand %p1827_p13, %p1821_p10 }
  0x2a   :  { %1831 = shalt.err (!%p1828_p0)
}
  0x2b   :  { %s2012_s22 = smov 64   ;;  %s2013_s2 = smov 4  }
  0x2c   :  { %108 = dma.hbm_to_vmem [thread:$0]  %s2299_s9, 1024, %s103_s29, [#allocation12], %s2012_s22, %s2012_s22, %s2013_s2  }
  0x2d   :  { %s1840_s24 = scalar_lea.vmem %s131_s30, 2048  ;;  %p1845_p2 = scmp.lt.s32.totalorder %s131_s30, %s131_s30 }
  0x2e   :  { %p1841_p1 = scmp.ne.s32.totalorder %s131_s30, %s1840_s24  ;;  %p1846_p3 = scmp.lt.s32.totalorder %s1840_s24, %s1840_s24 }
  0x30   :  { %p1847_p4 = por %p1846_p3, %p1845_p2 }
  0x32   :  { %p1848_p5 = pnand %p1847_p4, %p1841_p1 }
  0x34   :  { %1851 = shalt.err (!%p1848_p5)
}
  0x35   :  { %136 = dma.hbm_to_vmem [thread:$0]  %s2303_s13, 2048, %s131_s30, [#allocation15], %s2007_s21, %s2007_s21, %s2008_s1  }
  0x36   :  { %s2014_s26 = smov [#allocation2]   ;;  %s2015_s28 = smov [#allocation7]  }
  0x37   :  { %s37_s27 = sshll.u32 %s2014_s26, 4  ;;  %s60_s0 = sshll.u32 %s2015_s28, 4  ;;  %s38_s27 = int_to_ptr.vmem [resolvable:$true] %s37_s27  ;;  %s61_s0 = int_to_ptr.vmem [resolvable:$true] %s60_s0 }
  0x38   :  { %s1860_s9 = scalar_lea.vmem %s38_s27, 128  ;;  %p1865_p7 = scmp.lt.s32.totalorder %s38_s27, %s38_s27 }
  0x39   :  { %p1861_p6 = scmp.ne.s32.totalorder %s38_s27, %s1860_s9  ;;  %p1866_p8 = scmp.lt.s32.totalorder %s1860_s9, %s1860_s9 }
  0x3b   :  { %p1867_p9 = por %p1866_p8, %p1865_p7 }
  0x3d   :  { %p1868_p10 = pnand %p1867_p9, %p1861_p6 }
  0x3f   :  { %1871 = shalt.err (!%p1868_p10)
}
  0x40   :  { %s2315_s23 = sld [smem:[#allocation27_spill]]  ;;  %s1880_s5 = scalar_lea.vmem %s61_s0, 1024 }
  0x41   :  { %p1881_p11 = scmp.ne.s32.totalorder %s61_s0, %s1880_s5  ;;  %p1885_p12 = scmp.lt.s32.totalorder %s61_s0, %s61_s0 }
  0x42   :  { %p1886_p13 = scmp.lt.s32.totalorder %s1880_s5, %s1880_s5 }
  0x44   :  { %p1887_p0 = por %p1886_p13, %p1885_p12 }
  0x46   :  { %40 = dma.hbm_to_vmem [thread:$0]  %s2315_s23, 128, %s38_s27, [#allocation3]  }
  0x47   :  { %p1888_p1 = pnand %p1887_p0, %p1881_p11 }
  0x49   :  { %1891 = shalt.err (!%p1888_p1)
}
  0x4a   :  { %s2316_s1 = sld [smem:[#allocation30_spill]]  ;;  %s2016_s30 = smov [#allocation10]  }
  0x4b   :  { %s88_s24 = sshll.u32 %s2016_s30, 4  ;;  %s2017_s25 = smov [#allocation13]   ;;  %s89_s24 = int_to_ptr.vmem [resolvable:$true] %s88_s24 }
  0x4c   :  { %s116_s3 = sshll.u32 %s2017_s25, 4  ;;  %s1900_s26 = scalar_lea.vmem %s89_s24, 1024  ;;  %s117_s3 = int_to_ptr.vmem [resolvable:$true] %s116_s3 }
  0x4d   :  { %p1901_p2 = scmp.ne.s32.totalorder %s89_s24, %s1900_s26  ;;  %p1905_p3 = scmp.lt.s32.totalorder %s89_s24, %s89_s24 }
  0x4e   :  { %p1906_p4 = scmp.lt.s32.totalorder %s1900_s26, %s1900_s26 }
  0x50   :  { %66 = dma.hbm_to_vmem [thread:$0]  %s2316_s1, 1024, %s61_s0, [#allocation6], %s2012_s22, %s2012_s22, %s2013_s2  }
  0x51   :  { %p1907_p5 = por %p1906_p4, %p1905_p3 }
  0x53   :  { %p1908_p6 = pnand %p1907_p5, %p1901_p2 }
  0x55   :  { %1911 = shalt.err (!%p1908_p6)
}
  0x56   :  { %94 = dma.hbm_to_vmem [thread:$0]  %s2297_s7, 1024, %s89_s24, [#allocation9], %s2012_s22, %s2012_s22, %s2013_s2  }
  0x57   :  { %s1920_s0 = scalar_lea.vmem %s117_s3, 1024  ;;  %p1925_p8 = scmp.lt.s32.totalorder %s117_s3, %s117_s3 }
  0x58   :  { %p1921_p7 = scmp.ne.s32.totalorder %s117_s3, %s1920_s0  ;;  %p1926_p9 = scmp.lt.s32.totalorder %s1920_s0, %s1920_s0 }
  0x5a   :  { %p1927_p10 = por %p1926_p9, %p1925_p8 }
  0x5c   :  { %p1928_p11 = pnand %p1927_p10, %p1921_p7 }
  0x5e   :  { %1931 = shalt.err (!%p1928_p11)
}
  0x5f   :  { %122 = dma.hbm_to_vmem [thread:$0]  %s2301_s11, 1024, %s117_s3, [#allocation12], %s2012_s22, %s2012_s22, %s2013_s2  }
  0x60   :  { %s2018_s20 = smov [#allocation16]   ;;  %s2019_s5 = smov [#allocation17]  }
  0x61   :  { %s144_s23 = sshll.u32 %s2018_s20, 4  ;;  %s158_s13 = sshll.u32 %s2019_s5, 4  ;;  %s145_s23 = int_to_ptr.vmem [resolvable:$true] %s144_s23  ;;  %s159_s13 = int_to_ptr.vmem [resolvable:$true] %s158_s13 }
  0x62   :  { %s1940_s7 = scalar_lea.vmem %s145_s23, 1024  ;;  %p1945_p13 = scmp.lt.s32.totalorder %s145_s23, %s145_s23 }
  0x63   :  { %p1941_p12 = scmp.ne.s32.totalorder %s145_s23, %s1940_s7  ;;  %p1946_p0 = scmp.lt.s32.totalorder %s1940_s7, %s1940_s7 }
  0x65   :  { %p1947_p1 = por %p1946_p0, %p1945_p13 }
  0x67   :  { %p1948_p2 = pnand %p1947_p1, %p1941_p12 }
  0x69   :  { %1951 = shalt.err (!%p1948_p2)
}
  0x6a   :  { %150 = dma.hbm_to_vmem [thread:$0]  %s2305_s15, 1024, %s145_s23, [#allocation15], %s2012_s22, %s2012_s22, %s2013_s2  }
  0x6b   :  { %s1960_s11 = scalar_lea.vmem %s159_s13, 1024  ;;  %p1965_p4 = scmp.lt.s32.totalorder %s159_s13, %s159_s13 }
  0x6c   :  { %p1961_p3 = scmp.ne.s32.totalorder %s159_s13, %s1960_s11  ;;  %p1966_p5 = scmp.lt.s32.totalorder %s1960_s11, %s1960_s11 }
  0x6e   :  { %p1967_p6 = por %p1966_p5, %p1965_p4 }
  0x70   :  { %p1968_p7 = pnand %p1967_p6, %p1961_p3 }
  0x72   :  { %1971 = shalt.err (!%p1968_p7)
}
  0x73   :  { %164 = dma.hbm_to_vmem [thread:$0]  %s2307_s17, 1024, %s159_s13, [#allocation18], %s2012_s22, %s2012_s22, %s2013_s2  }
  0x74   :  { %1992 = dma.done.wait [#allocation3], 128  }
  0x75   :  { %1993 = vsyncadd [#allocation3], 4294967168 }
  0x76   :  { %1994 = dma.done.wait [#allocation6], 3072  }
  0x77   :  { %1995 = vsyncadd [#allocation6], 4294964224 }
  0x78   :  { %1996 = dma.done.wait [#allocation9], 3072  }
  0x79   :  { %1997 = vsyncadd [#allocation9], 4294964224 }
  0x7a   :  { %1998 = dma.done.wait [#allocation12], 2048  }
  0x7b   :  { %1999 = vsyncadd [#allocation12], 4294965248 }
  0x7c   :  { %2000 = dma.done.wait [#allocation15], 3072  }
  0x7d   :  { %2001 = vsyncadd [#allocation15], 4294964224 }
  0x7e   :  { %2002 = dma.done.wait [#allocation18], 1024  }
  0x7f   :  { %2003 = vsyncadd [#allocation18], 4294966272  ;;  %v2020_v0 = vmov 0   ;;  %v2021_v1 = vmov 0.0   ;;  %v1652_v2 = vld [vmem:[#allocation5 + $0x74] ss:$8 sps:$4 sm:$0xff]   ;;  %v218_v40 = vlaneseq }
  0x80   :  { %340 = vmatprep.mubr.bf16.mxu0 %v2020_v0  ;;  %1514 = vmatprep.subr.bf16.mxu1 %v2021_v1  ;;  %v1654_v3 = vld [vmem:[#allocation5 + $0x70] ss:$8 sps:$4 sm:$0xff]   ;;  %v1655_v4 = vld [vmem:[#allocation5 + $0x64] ss:$8 sps:$4 sm:$0xff]   ;;  %v1657_v5 = vld [vmem:[#allocation5 + $0x60] ss:$8 sps:$4 sm:$0xff]  }
  0x81   :  { %308 = vmatprep.subr.bf16.mxu0 %v1652_v2  ;;  %v1658_v6 = vld [vmem:[#allocation5 + $0x54] ss:$8 sps:$4 sm:$0xff]   ;;  %v1660_v7 = vld [vmem:[#allocation5 + $0x50] ss:$8 sps:$4 sm:$0xff]   ;;  %v1661_v8 = vld [vmem:[#allocation5 + $0x44] ss:$8 sps:$4 sm:$0xff]  }
  0x82   :  { %309 = vmatpush1.bf16.msra.mxu0 %v1654_v3  ;;  %v1663_v9 = vld [vmem:[#allocation5 + $0x40] ss:$8 sps:$4 sm:$0xff]   ;;  %v1676_v10 = vld [vmem:[#allocation7 + $0x38] sm:$0xff]   ;;  %v1677_v12 = vld [vmem:[#allocation7 + $0x30] sm:$0xff]   ;;  %vm2022_vm0 = vmmov 0   ;;  %v219_v41 = vshrl.u32 %v218_v40, 7 }
  0x83   :  { %310 = vmatprep.subr.bf16.mxu0 %v1655_v4  ;;  %v1664_v11 = vld [vmem:[#allocation5 + $0x34] ss:$8 sps:$4 sm:$0xff]   ;;  %1515 = vmatpush3.bf16.msra.mxu1 %v1676_v10  ;;  %v1666_v13 = vld [vmem:[#allocation5 + $0x30] ss:$8 sps:$4 sm:$0xff]   ;;  %v1667_v14 = vld [vmem:[#allocation5 + $0x24] ss:$8 sps:$4 sm:$0xff]  }
  0x84   :  { %1516 = vmatprep.subr.bf16.mxu1 %v2021_v1  ;;  %v1669_v15 = vld [vmem:[#allocation5 + $0x20] ss:$8 sps:$4 sm:$0xff]   ;;  %v1670_v17 = vld [vmem:[#allocation5 + $0x14] ss:$8 sps:$4 sm:$0xff]   ;;  %v1672_v19 = vld [vmem:[#allocation5 + $0x10] ss:$8 sps:$4 sm:$0xff]   ;;  %1530 = vmatprep.mubr.msk.bf16.mxu1 %vm2022_vm0, %v2021_v1 }
  0x85   :  { %v1678_v16 = vld [vmem:[#allocation7 + $0x28] sm:$0xff]   ;;  %v1679_v18 = vld [vmem:[#allocation7 + $0x20] sm:$0xff]   ;;  %v1680_v21 = vld [vmem:[#allocation7 + $0x18] sm:$0xff]   ;;  %v2194_v42 = vsub.s32 0, %v219_v41  ;;  %s2317_s22 = sld [smem:[#allocation29_spill]]  ;;  %v2209_v62 = vsub.s32 1, %v219_v41 }
  0x86   :  { %311 = vmatpush1.bf16.msra.mxu0 %v1657_v5  ;;  %v1673_v20 = vld [vmem:[#allocation5 + $0x4] ss:$8 sps:$4 sm:$0xff]   ;;  %v1675_v22 = vld [vmem:[#allocation5] ss:$8 sps:$4 sm:$0xff]   ;;  %v198_v23 = vld [vmem:[#allocation2] sm:$0xff]  ;;  %s2023_s23 = smov [#allocation19]  }
  0x87   :  { %312 = vmatprep.subr.bf16.mxu0 %v1658_v6  ;;  %1517 = vmatpush3.bf16.msra.mxu1 %v1677_v12  ;;  %v1681_v24 = vld [vmem:[#allocation7 + $0x10] sm:$0xff]   ;;  %v199_v25 = vpack.c.bf16 %v198_v23, %v198_v23  ;;  %v1682_v26 = vld [vmem:[#allocation7 + $0x8] sm:$0xff]   ;;  %v1683_v27 = vld [vmem:[#allocation7] sm:$0xff]   ;;  %s1344_s5 = sshll.u32 %s2023_s23, 4  ;;  %s1345_s5 = int_to_ptr.vmem [resolvable:$true] %s1344_s5 }
  0x88   :  { %1518 = vmatprep.subr.bf16.mxu1 %v2021_v1  ;;  %v1684_v28 = vld [vmem:[#allocation8 + $0x70] ss:$8 sps:$4 sm:$0xff]   ;;  %v1686_v29 = vld [vmem:[#allocation8 + $0x74] ss:$8 sps:$4 sm:$0xff]   ;;  %v1689_v30 = vld [vmem:[#allocation8 + $0x64] ss:$8 sps:$4 sm:$0xff]   ;;  %p1977_p9 = scmp.lt.s32.totalorder %s1345_s5, %s1345_s5 }
  0x89   :  { %v1687_v31 = vld [vmem:[#allocation8 + $0x60] ss:$8 sps:$4 sm:$0xff]   ;;  %v1692_v32 = vld [vmem:[#allocation8 + $0x54] ss:$8 sps:$4 sm:$0xff]   ;;  %v1690_v33 = vld [vmem:[#allocation8 + $0x50] ss:$8 sps:$4 sm:$0xff]  }
  0x8a   :  { %313 = vmatpush1.bf16.msra.mxu0 %v1660_v7  ;;  %v1695_v34 = vld [vmem:[#allocation8 + $0x44] ss:$8 sps:$4 sm:$0xff]   ;;  %v1693_v35 = vld [vmem:[#allocation8 + $0x40] ss:$8 sps:$4 sm:$0xff]   ;;  %v1698_v36 = vld [vmem:[#allocation8 + $0x34] ss:$8 sps:$4 sm:$0xff]  }
  0x8b   :  { %314 = vmatprep.subr.bf16.mxu0 %v1661_v8  ;;  %1519 = vmatpush3.bf16.msra.mxu1 %v1678_v16  ;;  %v1696_v37 = vld [vmem:[#allocation8 + $0x30] ss:$8 sps:$4 sm:$0xff]   ;;  %v1701_v38 = vld [vmem:[#allocation8 + $0x24] ss:$8 sps:$4 sm:$0xff]   ;;  %v1699_v39 = vld [vmem:[#allocation8 + $0x20] ss:$8 sps:$4 sm:$0xff]  }
  0x8c   :  { %1520 = vmatprep.subr.bf16.mxu1 %v2021_v1  ;;  %v216_v43 = vld [vmem:[%s2317_s22] sm:$0x3]  ;;  %v1704_v52 = vld [vmem:[#allocation8 + $0x14] ss:$8 sps:$4 sm:$0xff]   ;;  %v1707_v54 = vld [vmem:[#allocation8 + $0x4] ss:$8 sps:$4 sm:$0xff]  }
  0x8d   :  { %v221_v44 = vrot.slane %v216_v43, %v2194_v42  ;;  %v1702_v53 = vld [vmem:[#allocation8 + $0x10] ss:$8 sps:$4 sm:$0xff]   ;;  %v1705_v55 = vld [vmem:[#allocation8] ss:$8 sps:$4 sm:$0xff]   ;;  %v225_v63 = vrot.slane %v216_v43, %v2209_v62 }
  0x8e   :  { %315 = vmatpush1.bf16.msra.mxu0 %v1663_v9  ;;  %v1708_v56 = vld [vmem:[#allocation10 + $0x38] sm:$0xff]   ;;  %v1709_v57 = vld [vmem:[#allocation10 + $0x30] sm:$0xff]   ;;  %v1710_v58 = vld [vmem:[#allocation10 + $0x28] sm:$0xff]  }
  0x8f   :  { %316 = vmatprep.subr.bf16.mxu0 %v1664_v11  ;;  %1521 = vmatpush3.bf16.msra.mxu1 %v1679_v18  ;;  %v1711_v59 = vld [vmem:[#allocation10 + $0x20] sm:$0xff]   ;;  %v1712_v60 = vld [vmem:[#allocation10 + $0x18] sm:$0xff]   ;;  %v1713_v61 = vld [vmem:[#allocation10 + $0x10] sm:$0xff]  }
  0x90   :  { %1522 = vmatprep.subr.bf16.mxu1 %v2021_v1  ;;  %v1374_v2 = vld [vmem:[%s2294_s4] ss:$0 sm:$0xff]  ;;  %v1714_v12 = vld [vmem:[#allocation10 + $0x8] sm:$0xff]  }
  0x91   :  { %v1718_v16 = vld [vmem:[#allocation11 + $0x28] sm:$0xff]   ;;  %v1720_v18 = vld [vmem:[#allocation11 + $0x18] sm:$0xff]  }
  0x92   :  { %317 = vmatpush1.bf16.msra.mxu0 %v1666_v13  ;;  %v1715_v13 = vld [vmem:[#allocation10] sm:$0xff]  }
  0x93   :  { %318 = vmatprep.subr.bf16.mxu0 %v1667_v14  ;;  %1523 = vmatpush3.bf16.msra.mxu1 %v1680_v21  ;;  %v1716_v14 = vld [vmem:[#allocation11 + $0x38] sm:$0xff]  }
  0x94   :  { %1524 = vmatprep.subr.bf16.mxu1 %v2021_v1 }
  0x96   :  { %319 = vmatpush1.bf16.msra.mxu0 %v1669_v15  ;;  %v1717_v15 = vld [vmem:[#allocation11 + $0x30] sm:$0xff]  }
  0x97   :  { %320 = vmatprep.subr.bf16.mxu0 %v1670_v17  ;;  %1525 = vmatpush3.bf16.msra.mxu1 %v1681_v24  ;;  %v1719_v17 = vld [vmem:[#allocation11 + $0x20] sm:$0xff]  }
  0x98   :  { %1526 = vmatprep.subr.bf16.mxu1 %v2021_v1 }
  0x9a   :  { %321 = vmatpush1.bf16.msra.mxu0 %v1672_v19  ;;  %v1721_v19 = vld [vmem:[#allocation11 + $0x10] sm:$0xff]  }
  0x9b   :  { %322 = vmatprep.subr.bf16.mxu0 %v1673_v20  ;;  %1527 = vmatpush3.bf16.msra.mxu1 %v1682_v26  ;;  %v482_v20 = vld [vmem:[%s2296_s6] sm:$0x3] }
  0x9c   :  { %1528 = vmatprep.subr.bf16.mxu1 %v2021_v1  ;;  %v487_v21 = vrot.slane %v482_v20, %v2194_v42 }
  0x9e   :  { %323 = vmatpush1.bf16.msra.mxu0 %v1675_v22 }
  0x9f   :  { %1529 = vmatpush3.bf16.msra.mxu1 %v1683_v27  ;;  %574 = vmatprep.subr.bf16.mxu0 %v1686_v29  ;;  %v1722_v29 = vld [vmem:[#allocation11 + $0x8] sm:$0xff]  }
  0xa0   :  { %1534 = vmatprep.subr.bf16.mxu1 %v2021_v1 }
  0xa1   :  { %341 = vmatmul.mubr.bf16.vlgmr.msra.gmra.mxu0 %v199_v25 }
  0xa2   :  { %606 = vmatprep.mubr.bf16.mxu0 %v2020_v0  ;;  %575 = vmatpush1.bf16.msra.mxu0 %v1684_v28 }
  0xa3   :  { %576 = vmatprep.subr.bf16.mxu0 %v1689_v30  ;;  %v1723_v30 = vld [vmem:[#allocation11] sm:$0xff]  }
  0xa6   :  { %577 = vmatpush1.bf16.msra.mxu0 %v1687_v31  ;;  %v1724_v31 = vld [vmem:[#allocation13 + $0x38] sm:$0xff]  }
  0xa7   :  { %578 = vmatprep.subr.bf16.mxu0 %v1692_v32  ;;  %v1725_v32 = vld [vmem:[#allocation13 + $0x30] sm:$0xff]  }
  0xaa   :  { %579 = vmatpush1.bf16.msra.mxu0 %v1690_v33  ;;  %v1726_v33 = vld [vmem:[#allocation13 + $0x28] sm:$0xff]  }
  0xab   :  { %580 = vmatprep.subr.bf16.mxu0 %v1695_v34  ;;  %v1727_v34 = vld [vmem:[#allocation13 + $0x20] sm:$0xff]  }
  0xae   :  { %581 = vmatpush1.bf16.msra.mxu0 %v1693_v35  ;;  %v1728_v35 = vld [vmem:[#allocation13 + $0x18] sm:$0xff]  }
  0xaf   :  { %582 = vmatprep.subr.bf16.mxu0 %v1698_v36  ;;  %v1729_v36 = vld [vmem:[#allocation13 + $0x10] sm:$0xff]  }
  0xb2   :  { %583 = vmatpush1.bf16.msra.mxu0 %v1696_v37  ;;  %v491_v37 = vrot.slane %v482_v20, %v2209_v62 }
  0xb3   :  { %584 = vmatprep.subr.bf16.mxu0 %v1701_v38  ;;  %v1399_v38 = vld [vmem:[%s2298_s8] ss:$0 sm:$0xff] }
  0xb6   :  { %585 = vmatpush1.bf16.msra.mxu0 %v1699_v39 }
  0xb7   :  { %586 = vmatprep.subr.bf16.mxu0 %v1704_v52  ;;  %v1734_v52 = vld [vmem:[#allocation14 + $0x74] ss:$8 sps:$4 sm:$0xff]  }
  0xba   :  { %587 = vmatpush1.bf16.msra.mxu0 %v1702_v53  ;;  %v1737_v53 = vld [vmem:[#allocation14 + $0x64] ss:$8 sps:$4 sm:$0xff]  }
  0xbb   :  { %588 = vmatprep.subr.bf16.mxu0 %v1707_v54  ;;  %v1735_v54 = vld [vmem:[#allocation14 + $0x60] ss:$8 sps:$4 sm:$0xff]  }
  0xbe   :  { %589 = vmatpush1.bf16.msra.mxu0 %v1705_v55  ;;  %v1740_v55 = vld [vmem:[#allocation14 + $0x54] ss:$8 sps:$4 sm:$0xff]  }
  0xbf   :  { %1554 = vmatprep.subr.bf16.mxu0 %v2021_v1 }
 0x161   :  { %v342_v45 = vpop.f32.mrf.mxu0 }
 0x162   :  { %v343_v46 = vadd.f32 %v342_v45, %v221_v44 }
 0x163   :  { %v344_v47 = vpop.f32.mrf.mxu0 }
 0x164   :  { %v349_v48 = vmax.f32 %v343_v46, 0.0  ;;  %v345_v4 = vadd.f32 %v344_v47, %v225_v63  ;;  %v1408_v63 = vld [vmem:[%s2300_s10] ss:$0 sm:$0xff] }
 0x165   :  { %v346_v49 = vpop.f32.mrf.mxu0 }
 0x166   :  { %v350_v50 = vpack.c.bf16 %v349_v48, %v349_v48  ;;  %v1730_v49 = vld [vmem:[#allocation13 + $0x8] sm:$0xff]  }
 0x167   :  { %v347_v51 = vpop.f32.mrf.mxu0 }
 0x168   :  { %1531 = vmatmul.mubr.bf16.vlgmr.msra.gmra.mxu1 %v350_v50  ;;  %v1731_v50 = vld [vmem:[#allocation13] sm:$0xff]   ;;  %v1732_v51 = vld [vmem:[#allocation14 + $0x70] ss:$8 sps:$4 sm:$0xff]  }
 0x169   :  { %1550 = vmatprep.mubr.msk.bf16.mxu1 %vm2022_vm0, %v2021_v1  ;;  %1535 = vmatpush3.bf16.msra.mxu1 %v1708_v56  ;;  %v1738_v56 = vld [vmem:[#allocation14 + $0x50] ss:$8 sps:$4 sm:$0xff]  }
 0x16a   :  { %1536 = vmatprep.subr.bf16.mxu1 %v2021_v1 }
 0x16d   :  { %1537 = vmatpush3.bf16.msra.mxu1 %v1709_v57  ;;  %v1741_v57 = vld [vmem:[#allocation14 + $0x40] ss:$8 sps:$4 sm:$0xff]  }
 0x16e   :  { %1538 = vmatprep.subr.bf16.mxu1 %v2021_v1 }
 0x171   :  { %1539 = vmatpush3.bf16.msra.mxu1 %v1710_v58  ;;  %v1746_v58 = vld [vmem:[#allocation14 + $0x34] ss:$8 sps:$4 sm:$0xff]  }
 0x172   :  { %1540 = vmatprep.subr.bf16.mxu1 %v2021_v1 }
 0x175   :  { %1541 = vmatpush3.bf16.msra.mxu1 %v1711_v59  ;;  %v1744_v59 = vld [vmem:[#allocation14 + $0x30] ss:$8 sps:$4 sm:$0xff]  }
 0x176   :  { %1542 = vmatprep.subr.bf16.mxu1 %v2021_v1 }
 0x179   :  { %1543 = vmatpush3.bf16.msra.mxu1 %v1712_v60  ;;  %v1749_v60 = vld [vmem:[#allocation14 + $0x24] ss:$8 sps:$4 sm:$0xff]  }
 0x17a   :  { %1544 = vmatprep.subr.bf16.mxu1 %v2021_v1 }
 0x17d   :  { %1545 = vmatpush3.bf16.msra.mxu1 %v1713_v61  ;;  %v1747_v61 = vld [vmem:[#allocation14 + $0x20] ss:$8 sps:$4 sm:$0xff]  }
 0x17e   :  { %1546 = vmatprep.subr.bf16.mxu1 %v2021_v1 }
 0x181   :  { %1547 = vmatpush3.bf16.msra.mxu1 %v1714_v12  ;;  %v1753_v12 = vld [vmem:[#allocation14] ss:$8 sps:$4 sm:$0xff]  }
 0x182   :  { %1548 = vmatprep.subr.bf16.mxu1 %v2021_v1 }
 0x185   :  { %1549 = vmatpush3.bf16.msra.mxu1 %v1715_v13  ;;  %v1756_v13 = vld [vmem:[#allocation16 + $0x38] sm:$0xff]  }
 0x186   :  { %1574 = vmatprep.subr.bf16.mxu1 %v2021_v1 }
 0x228   :  { %v456_v3 = vpop.f32.mrf.mxu1 }
 0x229   :  { %v457_v5 = vadd.f32 %v1374_v2, %v456_v3 }
 0x22a   :  { %v1532_v6 = vpop.f32.mrf.mxu1 }
 0x22b   :  { %v462_v7 = vadd.f32 %v457_v5, %v345_v4 }
 0x22c   :  { %v459_v8 = vpop.f32.mrf.mxu1 }
 0x22d   :  { %v463_v9 = vmax.f32 %v462_v7, 0.0 }
 0x22e   :  { %v1533_v10 = vpop.f32.mrf.mxu1 }
 0x22f   :  { %464 = vst [vmem:[#allocation19] sm:$0xff] %v463_v9  ;;  %v465_v11 = vpack.c.bf16 %v463_v9, %v463_v9  ;;  %v1752_v9 = vld [vmem:[#allocation14 + $0x14] ss:$8 sps:$4 sm:$0xff]   ;;  %v1750_v10 = vld [vmem:[#allocation14 + $0x10] ss:$8 sps:$4 sm:$0xff]  }
 0x231   :  { %607 = vmatmul.mubr.bf16.vlgmr.msra.gmra.mxu0 %v465_v11  ;;  %v1755_v11 = vld [vmem:[#allocation14 + $0x4] ss:$8 sps:$4 sm:$0xff]  }
 0x232   :  { %1570 = vmatprep.mubr.msk.bf16.mxu0 %vm2022_vm0, %v2021_v1  ;;  %1555 = vmatpush3.bf16.msra.mxu0 %v1716_v14  ;;  %v1757_v14 = vld [vmem:[#allocation16 + $0x30] sm:$0xff]  }
 0x233   :  { %1556 = vmatprep.subr.bf16.mxu0 %v2021_v1 }
 0x236   :  { %1557 = vmatpush3.bf16.msra.mxu0 %v1717_v15  ;;  %v1758_v15 = vld [vmem:[#allocation16 + $0x28] sm:$0xff]  }
 0x237   :  { %1558 = vmatprep.subr.bf16.mxu0 %v2021_v1 }
 0x23a   :  { %1559 = vmatpush3.bf16.msra.mxu0 %v1718_v16  ;;  %v1759_v16 = vld [vmem:[#allocation16 + $0x20] sm:$0xff]  }
 0x23b   :  { %1560 = vmatprep.subr.bf16.mxu0 %v2021_v1 }
 0x23e   :  { %1561 = vmatpush3.bf16.msra.mxu0 %v1719_v17  ;;  %v1760_v17 = vld [vmem:[#allocation16 + $0x18] sm:$0xff]  }
 0x23f   :  { %1562 = vmatprep.subr.bf16.mxu0 %v2021_v1 }
 0x242   :  { %1563 = vmatpush3.bf16.msra.mxu0 %v1720_v18  ;;  %v1761_v18 = vld [vmem:[#allocation16 + $0x10] sm:$0xff]  }
 0x243   :  { %1564 = vmatprep.subr.bf16.mxu0 %v2021_v1 }
 0x246   :  { %1565 = vmatpush3.bf16.msra.mxu0 %v1721_v19  ;;  %v1417_v19 = vld [vmem:[%s2302_s12] ss:$0 sm:$0xff] }
 0x247   :  { %1566 = vmatprep.subr.bf16.mxu0 %v2021_v1 }
 0x24a   :  { %1567 = vmatpush3.bf16.msra.mxu0 %v1722_v29  ;;  %v1763_v29 = vld [vmem:[#allocation16] sm:$0xff]  }
 0x24b   :  { %1568 = vmatprep.subr.bf16.mxu0 %v2021_v1 }
 0x24e   :  { %1569 = vmatpush3.bf16.msra.mxu0 %v1723_v30  ;;  %v1764_v30 = vld [vmem:[#allocation17 + $0x38] sm:$0xff]  }
 0x24f   :  { %1068 = vmatprep.subr.bf16.mxu0 %v1734_v52 }
 0x2f1   :  { %v608_v22 = vpop.f32.mrf.mxu0 }
 0x2f2   :  { %v609_v23 = vadd.f32 %v608_v22, %v487_v21 }
 0x2f3   :  { %v610_v24 = vpop.f32.mrf.mxu0 }
 0x2f4   :  { %v615_v25 = vmax.f32 %v609_v23, 0.0  ;;  %v611_v40 = vadd.f32 %v610_v24, %v491_v37 }
 0x2f5   :  { %v612_v26 = vpop.f32.mrf.mxu0 }
 0x2f6   :  { %v616_v27 = vpack.c.bf16 %v615_v25, %v615_v25 }
 0x2f7   :  { %v613_v28 = vpop.f32.mrf.mxu0 }
 0x2f8   :  { %1551 = vmatmul.mubr.bf16.vlgmr.msra.gmra.mxu1 %v616_v27  ;;  %v1762_v28 = vld [vmem:[#allocation16 + $0x8] sm:$0xff]  }
 0x2f9   :  { %1590 = vmatprep.mubr.msk.bf16.mxu1 %vm2022_vm0, %v2021_v1  ;;  %1575 = vmatpush3.bf16.msra.mxu1 %v1724_v31  ;;  %v1765_v31 = vld [vmem:[#allocation17 + $0x30] sm:$0xff]  }
 0x2fa   :  { %1576 = vmatprep.subr.bf16.mxu1 %v2021_v1 }
 0x2fd   :  { %1577 = vmatpush3.bf16.msra.mxu1 %v1725_v32  ;;  %v1766_v32 = vld [vmem:[#allocation17 + $0x28] sm:$0xff]  }
 0x2fe   :  { %1578 = vmatprep.subr.bf16.mxu1 %v2021_v1 }
 0x301   :  { %1579 = vmatpush3.bf16.msra.mxu1 %v1726_v33  ;;  %v1767_v33 = vld [vmem:[#allocation17 + $0x20] sm:$0xff]  }
 0x302   :  { %1580 = vmatprep.subr.bf16.mxu1 %v2021_v1 }
 0x305   :  { %1581 = vmatpush3.bf16.msra.mxu1 %v1727_v34  ;;  %v1768_v34 = vld [vmem:[#allocation17 + $0x18] sm:$0xff]  }
 0x306   :  { %1582 = vmatprep.subr.bf16.mxu1 %v2021_v1 }
 0x309   :  { %1583 = vmatpush3.bf16.msra.mxu1 %v1728_v35  ;;  %v1769_v35 = vld [vmem:[#allocation17 + $0x10] sm:$0xff]  }
 0x30a   :  { %1584 = vmatprep.subr.bf16.mxu1 %v2021_v1 }
 0x30d   :  { %1585 = vmatpush3.bf16.msra.mxu1 %v1729_v36  ;;  %v976_v36 = vld [vmem:[%s2304_s14] sm:$0x3] }
 0x30e   :  { %1586 = vmatprep.subr.bf16.mxu1 %v2021_v1  ;;  %v981_v37 = vrot.slane %v976_v36, %v2194_v42  ;;  %v1442_v42 = vld [vmem:[%s2306_s16] ss:$0 sm:$0xff]  ;;  %s1972_s16 = scalar_lea.vmem %s1345_s5, 640 }
 0x30f   :  { %p1973_p8 = scmp.ne.s32.totalorder %s1345_s5, %s1972_s16  ;;  %p1978_p10 = scmp.lt.s32.totalorder %s1972_s16, %s1972_s16 }
 0x311   :  { %1587 = vmatpush3.bf16.msra.mxu1 %v1730_v49  ;;  %p1979_p11 = por %p1978_p10, %p1977_p9 }
 0x312   :  { %1588 = vmatprep.subr.bf16.mxu1 %v2021_v1 }
 0x313   :  { %p1980_p12 = pnand %p1979_p11, %p1973_p8 }
 0x315   :  { %1589 = vmatpush3.bf16.msra.mxu1 %v1731_v50 }
 0x316   :  { %1594 = vmatprep.subr.bf16.mxu1 %v2021_v1 }
 0x3b8   :  { %v722_v39 = vpop.f32.mrf.mxu1 }
 0x3b9   :  { %v723_v41 = vadd.f32 %v1399_v38, %v722_v39 }
 0x3ba   :  { %v1552_v43 = vpop.f32.mrf.mxu1 }
 0x3bb   :  { %v728_v44 = vadd.f32 %v723_v41, %v611_v40 }
 0x3bc   :  { %v725_v45 = vpop.f32.mrf.mxu1 }
 0x3bd   :  { %v2242_v46 = vmax.f32 %v728_v44, 0.0 }
 0x3be   :  { %v1553_v47 = vpop.f32.mrf.mxu1 }
 0x3bf   :  { %730 = vst [vmem:[#allocation19 + $0x8] sm:$0xff] %v2242_v46  ;;  %v731_v48 = vpack.c.bf16 %v2242_v46, %v2242_v46  ;;  %v1771_v47 = vld [vmem:[#allocation17] sm:$0xff]  }
 0x3c1   :  { %1571 = vmatmul.mubr.bf16.vlgmr.msra.gmra.mxu0 %v731_v48  ;;  %v985_v48 = vrot.slane %v976_v36, %v2209_v62 }
 0x3c2   :  { %1100 = vmatprep.mubr.bf16.mxu0 %v2020_v0  ;;  %1069 = vmatpush1.bf16.msra.mxu0 %v1732_v51  ;;  %v1743_v0 = vld [vmem:[#allocation14 + $0x44] ss:$8 sps:$4 sm:$0xff]  }
 0x3c3   :  { %1070 = vmatprep.subr.bf16.mxu0 %v1737_v53 }
 0x3c6   :  { %1071 = vmatpush1.bf16.msra.mxu0 %v1735_v54 }
 0x3c7   :  { %1072 = vmatprep.subr.bf16.mxu0 %v1740_v55 }
 0x3ca   :  { %1073 = vmatpush1.bf16.msra.mxu0 %v1738_v56 }
 0x3cb   :  { %1074 = vmatprep.subr.bf16.mxu0 %v1743_v0 }
 0x3ce   :  { %1075 = vmatpush1.bf16.msra.mxu0 %v1741_v57 }
 0x3cf   :  { %1076 = vmatprep.subr.bf16.mxu0 %v1746_v58 }
 0x3d2   :  { %1077 = vmatpush1.bf16.msra.mxu0 %v1744_v59 }
 0x3d3   :  { %1078 = vmatprep.subr.bf16.mxu0 %v1749_v60 }
 0x3d6   :  { %1079 = vmatpush1.bf16.msra.mxu0 %v1747_v61 }
 0x3d7   :  { %1080 = vmatprep.subr.bf16.mxu0 %v1752_v9 }
 0x3da   :  { %1081 = vmatpush1.bf16.msra.mxu0 %v1750_v10 }
 0x3db   :  { %1082 = vmatprep.subr.bf16.mxu0 %v1755_v11 }
 0x3de   :  { %1083 = vmatpush1.bf16.msra.mxu0 %v1753_v12 }
 0x3df   :  { %1614 = vmatprep.subr.bf16.mxu0 %v2021_v1 }
 0x481   :  { %v837_v2 = vpop.f32.mrf.mxu0 }
 0x482   :  { %v838_v3 = vadd.f32 %v1408_v63, %v837_v2 }
 0x483   :  { %v1572_v4 = vpop.f32.mrf.mxu0 }
 0x484   :  { %v843_v5 = vmax.f32 %v838_v3, 0.0 }
 0x485   :  { %v840_v6 = vpop.f32.mrf.mxu0 }
 0x486   :  { %v844_v7 = vpack.c.bf16 %v843_v5, %v843_v5 }
 0x487   :  { %v1573_v8 = vpop.f32.mrf.mxu0 }
 0x488   :  { %1591 = vmatmul.mubr.bf16.vlgmr.msra.gmra.mxu1 %v844_v7 }
 0x489   :  { %1610 = vmatprep.mubr.msk.bf16.mxu1 %vm2022_vm0, %v2021_v1  ;;  %1595 = vmatpush3.bf16.msra.mxu1 %v1756_v13 }
 0x48a   :  { %1596 = vmatprep.subr.bf16.mxu1 %v2021_v1 }
 0x48d   :  { %1597 = vmatpush3.bf16.msra.mxu1 %v1757_v14 }
 0x48e   :  { %1598 = vmatprep.subr.bf16.mxu1 %v2021_v1 }
 0x491   :  { %1599 = vmatpush3.bf16.msra.mxu1 %v1758_v15 }
 0x492   :  { %1600 = vmatprep.subr.bf16.mxu1 %v2021_v1 }
 0x495   :  { %1601 = vmatpush3.bf16.msra.mxu1 %v1759_v16 }
 0x496   :  { %1602 = vmatprep.subr.bf16.mxu1 %v2021_v1 }
 0x499   :  { %1603 = vmatpush3.bf16.msra.mxu1 %v1760_v17 }
 0x49a   :  { %1604 = vmatprep.subr.bf16.mxu1 %v2021_v1 }
 0x49d   :  { %1605 = vmatpush3.bf16.msra.mxu1 %v1761_v18 }
 0x49e   :  { %1606 = vmatprep.subr.bf16.mxu1 %v2021_v1 }
 0x4a1   :  { %1607 = vmatpush3.bf16.msra.mxu1 %v1762_v28 }
 0x4a2   :  { %1608 = vmatprep.subr.bf16.mxu1 %v2021_v1 }
 0x4a5   :  { %1609 = vmatpush3.bf16.msra.mxu1 %v1763_v29 }
 0x548   :  { %v950_v20 = vpop.f32.mrf.mxu1 }
 0x549   :  { %v951_v21 = vadd.f32 %v1417_v19, %v950_v20 }
 0x54a   :  { %v1592_v22 = vpop.f32.mrf.mxu1 }
 0x54b   :  { %v956_v23 = vadd.f32 %v951_v21, %v2242_v46  ;;  %v1770_v46 = vld [vmem:[#allocation17 + $0x8] sm:$0xff]  }
 0x54c   :  { %v953_v24 = vpop.f32.mrf.mxu1 }
 0x54d   :  { %v957_v25 = vmax.f32 %v956_v23, 0.0 }
 0x54e   :  { %v1593_v26 = vpop.f32.mrf.mxu1 }
 0x54f   :  { %958 = vst [vmem:[#allocation19 + $0x10] sm:$0xff] %v957_v25  ;;  %v959_v27 = vpack.c.bf16 %v957_v25, %v957_v25 }
 0x551   :  { %1101 = vmatmul.mubr.bf16.vlgmr.msra.gmra.mxu0 %v959_v27 }
 0x552   :  { %1630 = vmatprep.mubr.msk.bf16.mxu0 %vm2022_vm0, %v2021_v1  ;;  %1615 = vmatpush3.bf16.msra.mxu0 %v1764_v30 }
 0x553   :  { %1616 = vmatprep.subr.bf16.mxu0 %v2021_v1 }
 0x556   :  { %1617 = vmatpush3.bf16.msra.mxu0 %v1765_v31 }
 0x557   :  { %1618 = vmatprep.subr.bf16.mxu0 %v2021_v1 }
 0x55a   :  { %1619 = vmatpush3.bf16.msra.mxu0 %v1766_v32 }
 0x55b   :  { %1620 = vmatprep.subr.bf16.mxu0 %v2021_v1 }
 0x55e   :  { %1621 = vmatpush3.bf16.msra.mxu0 %v1767_v33 }
 0x55f   :  { %1622 = vmatprep.subr.bf16.mxu0 %v2021_v1 }
 0x562   :  { %1623 = vmatpush3.bf16.msra.mxu0 %v1768_v34 }
 0x563   :  { %1624 = vmatprep.subr.bf16.mxu0 %v2021_v1 }
 0x566   :  { %1625 = vmatpush3.bf16.msra.mxu0 %v1769_v35 }
 0x567   :  { %1626 = vmatprep.subr.bf16.mxu0 %v2021_v1 }
 0x56a   :  { %1627 = vmatpush3.bf16.msra.mxu0 %v1770_v46 }
 0x56b   :  { %1628 = vmatprep.subr.bf16.mxu0 %v2021_v1  ;;  %v1451_v1 = vld [vmem:[%s2308_s18] ss:$0 sm:$0xff] }
 0x56e   :  { %1629 = vmatpush3.bf16.msra.mxu0 %v1771_v47 }
 0x611   :  { %v1102_v38 = vpop.f32.mrf.mxu0 }
 0x612   :  { %v1103_v39 = vadd.f32 %v1102_v38, %v981_v37 }
 0x613   :  { %v1104_v40 = vpop.f32.mrf.mxu0 }
 0x614   :  { %v1109_v41 = vmax.f32 %v1103_v39, 0.0  ;;  %v1105_v50 = vadd.f32 %v1104_v40, %v985_v48 }
 0x615   :  { %v1106_v43 = vpop.f32.mrf.mxu0 }
 0x616   :  { %v1110_v44 = vpack.c.bf16 %v1109_v41, %v1109_v41 }
 0x617   :  { %v1107_v45 = vpop.f32.mrf.mxu0 }
 0x618   :  { %1611 = vmatmul.mubr.bf16.vlgmr.msra.gmra.mxu1 %v1110_v44 }
 0x6d8   :  { %v1216_v49 = vpop.f32.mrf.mxu1 }
 0x6d9   :  { %v1217_v51 = vadd.f32 %v1442_v42, %v1216_v49 }
 0x6da   :  { %v1612_v52 = vpop.f32.mrf.mxu1 }
 0x6db   :  { %v1222_v53 = vadd.f32 %v1217_v51, %v1105_v50 }
 0x6dc   :  { %v1219_v54 = vpop.f32.mrf.mxu1 }
 0x6dd   :  { %v1223_v55 = vmax.f32 %v1222_v53, 0.0 }
 0x6de   :  { %v1613_v56 = vpop.f32.mrf.mxu1 }
 0x6df   :  { %1224 = vst [vmem:[#allocation19 + $0x18] sm:$0xff] %v1223_v55  ;;  %v1225_v0 = vpack.c.bf16 %v1223_v55, %v1223_v55 }
 0x6e1   :  { %1631 = vmatmul.mubr.bf16.vlgmr.msra.gmra.mxu0 %v1225_v0 }
 0x7a1   :  { %v1331_v62 = vpop.f32.mrf.mxu0 }
 0x7a2   :  { %v1332_v57 = vadd.f32 %v1451_v1, %v1331_v62 }
 0x7a3   :  { %v1632_v58 = vpop.f32.mrf.mxu0 }
 0x7a4   :  { %1337 = vst [vmem:[#allocation19 + $0x20] sm:$0xff] %v1332_v57 }
 0x7a5   :  { %v1334_v59 = vpop.f32.mrf.mxu0 }
 0x7a6   :  { %1983 = shalt.err (!%p1980_p12)
}
 0x7a7   :  { %1347 = dma.vmem_to_hbm [thread:$0]  %s1345_s5, 640, %s2309_s19, [#allocation4]   ;;  %v1633_v60 = vpop.f32.mrf.mxu0 }
 0x7a8   :  { %2004 = dma.done.wait [#allocation4], 640  }
 0x7a9   :  { %2005 = vsyncadd [#allocation4], 4294966656 }
 0x7aa   :  { %1351 = vsyncpa [#allocation3], 1 }
 0x7ab   :  { %1352 = vsyncpa [#allocation6], 1 }
 0x7ac   :  { %1353 = vsyncpa [#allocation9], 1 }
 0x7ad   :  { %1354 = vsyncpa [#allocation12], 1 }
 0x7ae   :  { %1355 = vsyncpa [#allocation15], 1 }
 0x7af   :  { %1356 = vsyncpa [#allocation18], 1 }
 0x7b0   :  { %1357 = vsyncpa [#allocation4], 1 }

// kernel: tpu_custom_call.1
= control target key start
LH: loop header
LB: loop body
LE: loop exit
PB: predicated region body
PF: predicated region fallthrough
CT: control target
= control target key end

     0   :  { %s2290_s0 = inlined_call_operand.hbm [shape: f32[8,128], index: 0, kind: input, shape index: {}]   ;;  %s2291_s1 = inlined_call_operand.hbm [shape: bf16[128,256], index: 1, kind: input, shape index: {}]   ;;  %s2292_s2 = inlined_call_operand.vmem [shape: f32[1,256], index: 2, kind: input, shape index: {}]   ;;  %s2293_s3 = inlined_call_operand.hbm [shape: bf16[128,128], index: 3, kind: input, shape index: {}]   ;;  %s2294_s4 = inlined_call_operand.vmem [shape: f32[1,128], index: 4, kind: input, shape index: {}]   ;;  %s2295_s5 = inlined_call_operand.hbm [shape: bf16[128,256], index: 5, kind: input, shape index: {}]   ;;  %s2296_s6 = inlined_call_operand.vmem [shape: f32[1,256], index: 6, kind: input, shape index: {}]   ;;  %s2297_s7 = inlined_call_operand.hbm [shape: bf16[128,128], index: 7, kind: input, shape index: {}]   ;;  %s2298_s8 = inlined_call_operand.vmem [shape: f32[1,128], index: 8, kind: input, shape index: {}]   ;;  %s2299_s9 = inlined_call_operand.hbm [shape: bf16[128,128], index: 9, kind: input, shape index: {}]   ;;  %s2300_s10 = inlined_call_operand.vmem [shape: f32[1,128], index: 10, kind: input, shape index: {}]   ;;  %s2301_s11 = inlined_call_operand.hbm [shape: bf16[128,128], index: 11, kind: input, shape index: {}]   ;;  %s2302_s12 = inlined_call_operand.vmem [shape: f32[1,128], index: 12, kind: input, shape index: {}]   ;;  %s2303_s13 = inlined_call_operand.hbm [shape: bf16[128,256], index: 13, kind: input, shape index: {}]   ;;  %s2304_s14 = inlined_call_operand.vmem [shape: f32[1,256], index: 14, kind: input, shape index: {}]   ;;  %s2305_s15 = inlined_call_operand.hbm [shape: bf16[128,128], index: 15, kind: input, shape index: {}]   ;;  %s2306_s16 = inlined_call_operand.vmem [shape: f32[1,128], index: 16, kind: input, shape index: {}]   ;;  %s2307_s17 = inlined_call_operand.hbm [shape: bf16[128,128], index: 17, kind: input, shape index: {}]   ;;  %s2308_s18 = inlined_call_operand.vmem [shape: f32[1,128], index: 18, kind: input, shape index: {}]   ;;  %s2309_s19 = inlined_call_operand.hbm [shape: f32[8,640], index: 19, kind: output, shape index: {}]  }
   0x1   :  { %2310 = sst [smem:[#allocation27_spill]] %s2290_s0 }
   0x2   :  { %2311 = sst [smem:[#allocation28_spill]] %s2291_s1 }
   0x3   :  { %2312 = sst [smem:[#allocation29_spill]] %s2292_s2 }
   0x4   :  { %2313 = sst [smem:[#allocation30_spill]] %s2293_s3 }
   0x5   :  { %24 = vsyncpa [#allocation3], 0 }
   0x6   :  { %25 = vsyncpa [#allocation6], 0 }
   0x7   :  { %26 = vsyncpa [#allocation9], 0 }
   0x8   :  { %27 = vsyncpa [#allocation12], 0 }
   0x9   :  { %28 = vsyncpa [#allocation15], 0 }
   0xa   :  { %29 = vsyncpa [#allocation18], 0 }
   0xb   :  { %30 = vsyncpa [#allocation4], 0  ;;  %s2006_s0 = smov [#allocation5]  }
   0xc   :  { %s46_s30 = sshll.u32 %s2006_s0, 4  ;;  %s47_s30 = int_to_ptr.vmem [resolvable:$true] %s46_s30 }
   0xd   :  { %s1780_s20 = scalar_lea.vmem %s47_s30, 2048  ;;  %p1785_p1 = scmp.lt.s32.totalorder %s47_s30, %s47_s30 }
   0xe   :  { %p1781_p0 = scmp.ne.s32.totalorder %s47_s30, %s1780_s20  ;;  %p1786_p2 = scmp.lt.s32.totalorder %s1780_s20, %s1780_s20 }
  0x10   :  { %p1787_p3 = por %p1786_p2, %p1785_p1 }
  0x12   :  { %p1788_p4 = pnand %p1787_p3, %p1781_p0 }
  0x14   :  { %1791 = shalt.err (!%p1788_p4)
}
  0x15   :  { %s2007_s21 = smov 128   ;;  %s2008_s1 = smov 8  }
  0x16   :  { %s2314_s23 = sld [smem:[#allocation28_spill]]  ;;  %s2009_s24 = smov [#allocation8]  }
  0x17   :  { %s74_s25 = sshll.u32 %s2009_s24, 4  ;;  %s75_s25 = int_to_ptr.vmem [resolvable:$true] %s74_s25 }
  0x18   :  { %s1800_s3 = scalar_lea.vmem %s75_s25, 2048  ;;  %p1805_p6 = scmp.lt.s32.totalorder %s75_s25, %s75_s25 }
  0x19   :  { %p1801_p5 = scmp.ne.s32.totalorder %s75_s25, %s1800_s3  ;;  %p1806_p7 = scmp.lt.s32.totalorder %s1800_s3, %s1800_s3 }
  0x1b   :  { %p1807_p8 = por %p1806_p7, %p1805_p6 }
  0x1c   :  { %52 = dma.hbm_to_vmem [thread:$0]  %s2314_s23, 2048, %s47_s30, [#allocation6], %s2007_s21, %s2007_s21, %s2008_s1  }
  0x1d   :  { %p1808_p9 = pnand %p1807_p8, %p1801_p5 }
  0x1f   :  { %1811 = shalt.err (!%p1808_p9)
}
  0x20   :  { %80 = dma.hbm_to_vmem [thread:$0]  %s2295_s5, 2048, %s75_s25, [#allocation9], %s2007_s21, %s2007_s21, %s2008_s1  }
  0x21   :  { %s2010_s28 = smov [#allocation11]   ;;  %s2011_s0 = smov [#allocation14]  }
  0x22   :  { %s102_s29 = sshll.u32 %s2010_s28, 4  ;;  %s130_s30 = sshll.u32 %s2011_s0, 4  ;;  %s103_s29 = int_to_ptr.vmem [resolvable:$true] %s102_s29  ;;  %s131_s30 = int_to_ptr.vmem [resolvable:$true] %s130_s30 }
  0x23   :  { %s1820_s20 = scalar_lea.vmem %s103_s29, 1024  ;;  %p1825_p11 = scmp.lt.s32.totalorder %s103_s29, %s103_s29 }
  0x24   :  { %p1821_p10 = scmp.ne.s32.totalorder %s103_s29, %s1820_s20  ;;  %p1826_p12 = scmp.lt.s32.totalorder %s1820_s20, %s1820_s20 }
  0x26   :  { %p1827_p13 = por %p1826_p12, %p1825_p11 }
  0x28   :  { %p1828_p0 = pnand %p1827_p13, %p1821_p10 }
  0x2a   :  { %1831 = shalt.err (!%p1828_p0)
}
  0x2b   :  { %s2012_s22 = smov 64   ;;  %s2013_s2 = smov 4  }
  0x2c   :  { %108 = dma.hbm_to_vmem [thread:$0]  %s2299_s9, 1024, %s103_s29, [#allocation12], %s2012_s22, %s2012_s22, %s2013_s2  }
  0x2d   :  { %s1840_s24 = scalar_lea.vmem %s131_s30, 2048  ;;  %p1845_p2 = scmp.lt.s32.totalorder %s131_s30, %s131_s30 }
  0x2e   :  { %p1841_p1 = scmp.ne.s32.totalorder %s131_s30, %s1840_s24  ;;  %p1846_p3 = scmp.lt.s32.totalorder %s1840_s24, %s1840_s24 }
  0x30   :  { %p1847_p4 = por %p1846_p3, %p1845_p2 }
  0x32   :  { %p1848_p5 = pnand %p1847_p4, %p1841_p1 }
  0x34   :  { %1851 = shalt.err (!%p1848_p5)
}
  0x35   :  { %136 = dma.hbm_to_vmem [thread:$0]  %s2303_s13, 2048, %s131_s30, [#allocation15], %s2007_s21, %s2007_s21, %s2008_s1  }
  0x36   :  { %s2014_s26 = smov [#allocation2]   ;;  %s2015_s28 = smov [#allocation7]  }
  0x37   :  { %s37_s27 = sshll.u32 %s2014_s26, 4  ;;  %s60_s0 = sshll.u32 %s2015_s28, 4  ;;  %s38_s27 = int_to_ptr.vmem [resolvable:$true] %s37_s27  ;;  %s61_s0 = int_to_ptr.vmem [resolvable:$true] %s60_s0 }
  0x38   :  { %s1860_s9 = scalar_lea.vmem %s38_s27, 128  ;;  %p1865_p7 = scmp.lt.s32.totalorder %s38_s27, %s38_s27 }
  0x39   :  { %p1861_p6 = scmp.ne.s32.totalorder %s38_s27, %s1860_s9  ;;  %p1866_p8 = scmp.lt.s32.totalorder %s1860_s9, %s1860_s9 }
  0x3b   :  { %p1867_p9 = por %p1866_p8, %p1865_p7 }
  0x3d   :  { %p1868_p10 = pnand %p1867_p9, %p1861_p6 }
  0x3f   :  { %1871 = shalt.err (!%p1868_p10)
}
  0x40   :  { %s2315_s23 = sld [smem:[#allocation27_spill]]  ;;  %s1880_s5 = scalar_lea.vmem %s61_s0, 1024 }
  0x41   :  { %p1881_p11 = scmp.ne.s32.totalorder %s61_s0, %s1880_s5  ;;  %p1885_p12 = scmp.lt.s32.totalorder %s61_s0, %s61_s0 }
  0x42   :  { %p1886_p13 = scmp.lt.s32.totalorder %s1880_s5, %s1880_s5 }
  0x44   :  { %p1887_p0 = por %p1886_p13, %p1885_p12 }
  0x46   :  { %40 = dma.hbm_to_vmem [thread:$0]  %s2315_s23, 128, %s38_s27, [#allocation3]  }
  0x47   :  { %p1888_p1 = pnand %p1887_p0, %p1881_p11 }
  0x49   :  { %1891 = shalt.err (!%p1888_p1)
}
  0x4a   :  { %s2316_s1 = sld [smem:[#allocation30_spill]]  ;;  %s2016_s30 = smov [#allocation10]  }
  0x4b   :  { %s88_s24 = sshll.u32 %s2016_s30, 4  ;;  %s2017_s25 = smov [#allocation13]   ;;  %s89_s24 = int_to_ptr.vmem [resolvable:$true] %s88_s24 }
  0x4c   :  { %s116_s3 = sshll.u32 %s2017_s25, 4  ;;  %s1900_s26 = scalar_lea.vmem %s89_s24, 1024  ;;  %s117_s3 = int_to_ptr.vmem [resolvable:$true] %s116_s3 }
  0x4d   :  { %p1901_p2 = scmp.ne.s32.totalorder %s89_s24, %s1900_s26  ;;  %p1905_p3 = scmp.lt.s32.totalorder %s89_s24, %s89_s24 }
  0x4e   :  { %p1906_p4 = scmp.lt.s32.totalorder %s1900_s26, %s1900_s26 }
  0x50   :  { %66 = dma.hbm_to_vmem [thread:$0]  %s2316_s1, 1024, %s61_s0, [#allocation6], %s2012_s22, %s2012_s22, %s2013_s2  }
  0x51   :  { %p1907_p5 = por %p1906_p4, %p1905_p3 }
  0x53   :  { %p1908_p6 = pnand %p1907_p5, %p1901_p2 }
  0x55   :  { %1911 = shalt.err (!%p1908_p6)
}
  0x56   :  { %94 = dma.hbm_to_vmem [thread:$0]  %s2297_s7, 1024, %s89_s24, [#allocation9], %s2012_s22, %s2012_s22, %s2013_s2  }
  0x57   :  { %s1920_s0 = scalar_lea.vmem %s117_s3, 1024  ;;  %p1925_p8 = scmp.lt.s32.totalorder %s117_s3, %s117_s3 }
  0x58   :  { %p1921_p7 = scmp.ne.s32.totalorder %s117_s3, %s1920_s0  ;;  %p1926_p9 = scmp.lt.s32.totalorder %s1920_s0, %s1920_s0 }
  0x5a   :  { %p1927_p10 = por %p1926_p9, %p1925_p8 }
  0x5c   :  { %p1928_p11 = pnand %p1927_p10, %p1921_p7 }
  0x5e   :  { %1931 = shalt.err (!%p1928_p11)
}
  0x5f   :  { %122 = dma.hbm_to_vmem [thread:$0]  %s2301_s11, 1024, %s117_s3, [#allocation12], %s2012_s22, %s2012_s22, %s2013_s2  }
  0x60   :  { %s2018_s20 = smov [#allocation16]   ;;  %s2019_s5 = smov [#allocation17]  }
  0x61   :  { %s144_s23 = sshll.u32 %s2018_s20, 4  ;;  %s158_s13 = sshll.u32 %s2019_s5, 4  ;;  %s145_s23 = int_to_ptr.vmem [resolvable:$true] %s144_s23  ;;  %s159_s13 = int_to_ptr.vmem [resolvable:$true] %s158_s13 }
  0x62   :  { %s1940_s7 = scalar_lea.vmem %s145_s23, 1024  ;;  %p1945_p13 = scmp.lt.s32.totalorder %s145_s23, %s145_s23 }
  0x63   :  { %p1941_p12 = scmp.ne.s32.totalorder %s145_s23, %s1940_s7  ;;  %p1946_p0 = scmp.lt.s32.totalorder %s1940_s7, %s1940_s7 }
  0x65   :  { %p1947_p1 = por %p1946_p0, %p1945_p13 }
  0x67   :  { %p1948_p2 = pnand %p1947_p1, %p1941_p12 }
  0x69   :  { %1951 = shalt.err (!%p1948_p2)
}
  0x6a   :  { %150 = dma.hbm_to_vmem [thread:$0]  %s2305_s15, 1024, %s145_s23, [#allocation15], %s2012_s22, %s2012_s22, %s2013_s2  }
  0x6b   :  { %s1960_s11 = scalar_lea.vmem %s159_s13, 1024  ;;  %p1965_p4 = scmp.lt.s32.totalorder %s159_s13, %s159_s13 }
  0x6c   :  { %p1961_p3 = scmp.ne.s32.totalorder %s159_s13, %s1960_s11  ;;  %p1966_p5 = scmp.lt.s32.totalorder %s1960_s11, %s1960_s11 }
  0x6e   :  { %p1967_p6 = por %p1966_p5, %p1965_p4 }
  0x70   :  { %p1968_p7 = pnand %p1967_p6, %p1961_p3 }
  0x72   :  { %1971 = shalt.err (!%p1968_p7)
}
  0x73   :  { %164 = dma.hbm_to_vmem [thread:$0]  %s2307_s17, 1024, %s159_s13, [#allocation18], %s2012_s22, %s2012_s22, %s2013_s2  }
  0x74   :  { %1992 = dma.done.wait [#allocation3], 128  }
  0x75   :  { %1993 = vsyncadd [#allocation3], 4294967168 }
  0x76   :  { %1994 = dma.done.wait [#allocation6], 3072  }
  0x77   :  { %1995 = vsyncadd [#allocation6], 4294964224 }
  0x78   :  { %1996 = dma.done.wait [#allocation9], 3072  }
  0x79   :  { %1997 = vsyncadd [#allocation9], 4294964224 }
  0x7a   :  { %1998 = dma.done.wait [#allocation12], 2048  }
  0x7b   :  { %1999 = vsyncadd [#allocation12], 4294965248 }
  0x7c   :  { %2000 = dma.done.wait [#allocation15], 3072  }
  0x7d   :  { %2001 = vsyncadd [#allocation15], 4294964224 }
  0x7e   :  { %2002 = dma.done.wait [#allocation18], 1024  }
  0x7f   :  { %2003 = vsyncadd [#allocation18], 4294966272  ;;  %v2020_v0 = vmov 0   ;;  %v2021_v1 = vmov 0.0   ;;  %v1652_v2 = vld [vmem:[#allocation5 + $0x74] ss:$8 sps:$4 sm:$0xff]   ;;  %v218_v40 = vlaneseq }
  0x80   :  { %340 = vmatprep.mubr.bf16.mxu0 %v2020_v0  ;;  %1514 = vmatprep.subr.bf16.mxu1 %v2021_v1  ;;  %v1654_v3 = vld [vmem:[#allocation5 + $0x70] ss:$8 sps:$4 sm:$0xff]   ;;  %v1655_v4 = vld [vmem:[#allocation5 + $0x64] ss:$8 sps:$4 sm:$0xff]   ;;  %v1657_v5 = vld [vmem:[#allocation5 + $0x60] ss:$8 sps:$4 sm:$0xff]  }
  0x81   :  { %308 = vmatprep.subr.bf16.mxu0 %v1652_v2  ;;  %v1658_v6 = vld [vmem:[#allocation5 + $0x54] ss:$8 sps:$4 sm:$0xff]   ;;  %v1660_v7 = vld [vmem:[#allocation5 + $0x50] ss:$8 sps:$4 sm:$0xff]   ;;  %v1661_v8 = vld [vmem:[#allocation5 + $0x44] ss:$8 sps:$4 sm:$0xff]  }
  0x82   :  { %309 = vmatpush1.bf16.msra.mxu0 %v1654_v3  ;;  %v1663_v9 = vld [vmem:[#allocation5 + $0x40] ss:$8 sps:$4 sm:$0xff]   ;;  %v1676_v10 = vld [vmem:[#allocation7 + $0x38] sm:$0xff]   ;;  %v1677_v12 = vld [vmem:[#allocation7 + $0x30] sm:$0xff]   ;;  %vm2022_vm0 = vmmov 0   ;;  %v219_v41 = vshrl.u32 %v218_v40, 7 }
  0x83   :  { %310 = vmatprep.subr.bf16.mxu0 %v1655_v4  ;;  %v1664_v11 = vld [vmem:[#allocation5 + $0x34] ss:$8 sps:$4 sm:$0xff]   ;;  %1515 = vmatpush3.bf16.msra.mxu1 %v1676_v10  ;;  %v1666_v13 = vld [vmem:[#allocation5 + $0x30] ss:$8 sps:$4 sm:$0xff]   ;;  %v1667_v14 = vld [vmem:[#allocation5 + $0x24] ss:$8 sps:$4 sm:$0xff]  }
  0x84   :  { %1516 = vmatprep.subr.bf16.mxu1 %v2021_v1  ;;  %v1669_v15 = vld [vmem:[#allocation5 + $0x20] ss:$8 sps:$4 sm:$0xff]   ;;  %v1670_v17 = vld [vmem:[#allocation5 + $0x14] ss:$8 sps:$4 sm:$0xff]   ;;  %v1672_v19 = vld [vmem:[#allocation5 + $0x10] ss:$8 sps:$4 sm:$0xff]   ;;  %1530 = vmatprep.mubr.msk.bf16.mxu1 %vm2022_vm0, %v2021_v1 }
  0x85   :  { %v1678_v16 = vld [vmem:[#allocation7 + $0x28] sm:$0xff]   ;;  %v1679_v18 = vld [vmem:[#allocation7 + $0x20] sm:$0xff]   ;;  %v1680_v21 = vld [vmem:[#allocation7 + $0x18] sm:$0xff]   ;;  %v2194_v42 = vsub.s32 0, %v219_v41  ;;  %s2317_s22 = sld [smem:[#allocation29_spill]]  ;;  %v2209_v62 = vsub.s32 1, %v219_v41 }
  0x86   :  { %311 = vmatpush1.bf16.msra.mxu0 %v1657_v5  ;;  %v1673_v20 = vld [vmem:[#allocation5 + $0x4] ss:$8 sps:$4 sm:$0xff]   ;;  %v1675_v22 = vld [vmem:[#allocation5] ss:$8 sps:$4 sm:$0xff]   ;;  %v198_v23 = vld [vmem:[#allocation2] sm:$0xff]  ;;  %s2023_s23 = smov [#allocation19]  }
  0x87   :  { %312 = vmatprep.subr.bf16.mxu0 %v1658_v6  ;;  %1517 = vmatpush3.bf16.msra.mxu1 %v1677_v12  ;;  %v1681_v24 = vld [vmem:[#allocation7 + $0x10] sm:$0xff]   ;;  %v199_v25 = vpack.c.bf16 %v198_v23, %v198_v23  ;;  %v1682_v26 = vld [vmem:[#allocation7 + $0x8] sm:$0xff]   ;;  %v1683_v27 = vld [vmem:[#allocation7] sm:$0xff]   ;;  %s1344_s5 = sshll.u32 %s2023_s23, 4  ;;  %s1345_s5 = int_to_ptr.vmem [resolvable:$true] %s1344_s5 }
  0x88   :  { %1518 = vmatprep.subr.bf16.mxu1 %v2021_v1  ;;  %v1684_v28 = vld [vmem:[#allocation8 + $0x70] ss:$8 sps:$4 sm:$0xff]   ;;  %v1686_v29 = vld [vmem:[#allocation8 + $0x74] ss:$8 sps:$4 sm:$0xff]   ;;  %v1689_v30 = vld [vmem:[#allocation8 + $0x64] ss:$8 sps:$4 sm:$0xff]   ;;  %p1977_p9 = scmp.lt.s32.totalorder %s1345_s5, %s1345_s5 }
  0x89   :  { %v1687_v31 = vld [vmem:[#allocation8 + $0x60] ss:$8 sps:$4 sm:$0xff]   ;;  %v1692_v32 = vld [vmem:[#allocation8 + $0x54] ss:$8 sps:$4 sm:$0xff]   ;;  %v1690_v33 = vld [vmem:[#allocation8 + $0x50] ss:$8 sps:$4 sm:$0xff]  }
  0x8a   :  { %313 = vmatpush1.bf16.msra.mxu0 %v1660_v7  ;;  %v1695_v34 = vld [vmem:[#allocation8 + $0x44] ss:$8 sps:$4 sm:$0xff]   ;;  %v1693_v35 = vld [vmem:[#allocation8 + $0x40] ss:$8 sps:$4 sm:$0xff]   ;;  %v1698_v36 = vld [vmem:[#allocation8 + $0x34] ss:$8 sps:$4 sm:$0xff]  }
  0x8b   :  { %314 = vmatprep.subr.bf16.mxu0 %v1661_v8  ;;  %1519 = vmatpush3.bf16.msra.mxu1 %v1678_v16  ;;  %v1696_v37 = vld [vmem:[#allocation8 + $0x30] ss:$8 sps:$4 sm:$0xff]   ;;  %v1701_v38 = vld [vmem:[#allocation8 + $0x24] ss:$8 sps:$4 sm:$0xff]   ;;  %v1699_v39 = vld [vmem:[#allocation8 + $0x20] ss:$8 sps:$4 sm:$0xff]  }
  0x8c   :  { %1520 = vmatprep.subr.bf16.mxu1 %v2021_v1  ;;  %v216_v43 = vld [vmem:[%s2317_s22] sm:$0x3]  ;;  %v1704_v52 = vld [vmem:[#allocation8 + $0x14] ss:$8 sps:$4 sm:$0xff]   ;;  %v1707_v54 = vld [vmem:[#allocation8 + $0x4] ss:$8 sps:$4 sm:$0xff]  }
  0x8d   :  { %v221_v44 = vrot.slane %v216_v43, %v2194_v42  ;;  %v1702_v53 = vld [vmem:[#allocation8 + $0x10] ss:$8 sps:$4 sm:$0xff]   ;;  %v1705_v55 = vld [vmem:[#allocation8] ss:$8 sps:$4 sm:$0xff]   ;;  %v225_v63 = vrot.slane %v216_v43, %v2209_v62 }
  0x8e   :  { %315 = vmatpush1.bf16.msra.mxu0 %v1663_v9  ;;  %v1708_v56 = vld [vmem:[#allocation10 + $0x38] sm:$0xff]   ;;  %v1709_v57 = vld [vmem:[#allocation10 + $0x30] sm:$0xff]   ;;  %v1710_v58 = vld [vmem:[#allocation10 + $0x28] sm:$0xff]  }
  0x8f   :  { %316 = vmatprep.subr.bf16.mxu0 %v1664_v11  ;;  %1521 = vmatpush3.bf16.msra.mxu1 %v1679_v18  ;;  %v1711_v59 = vld [vmem:[#allocation10 + $0x20] sm:$0xff]   ;;  %v1712_v60 = vld [vmem:[#allocation10 + $0x18] sm:$0xff]   ;;  %v1713_v61 = vld [vmem:[#allocation10 + $0x10] sm:$0xff]  }
  0x90   :  { %1522 = vmatprep.subr.bf16.mxu1 %v2021_v1  ;;  %v1374_v2 = vld [vmem:[%s2294_s4] ss:$0 sm:$0xff]  ;;  %v1714_v12 = vld [vmem:[#allocation10 + $0x8] sm:$0xff]  }
  0x91   :  { %v1718_v16 = vld [vmem:[#allocation11 + $0x28] sm:$0xff]   ;;  %v1720_v18 = vld [vmem:[#allocation11 + $0x18] sm:$0xff]  }
  0x92   :  { %317 = vmatpush1.bf16.msra.mxu0 %v1666_v13  ;;  %v1715_v13 = vld [vmem:[#allocation10] sm:$0xff]  }
  0x93   :  { %318 = vmatprep.subr.bf16.mxu0 %v1667_v14  ;;  %1523 = vmatpush3.bf16.msra.mxu1 %v1680_v21  ;;  %v1716_v14 = vld [vmem:[#allocation11 + $0x38] sm:$0xff]  }
  0x94   :  { %1524 = vmatprep.subr.bf16.mxu1 %v2021_v1 }
  0x96   :  { %319 = vmatpush1.bf16.msra.mxu0 %v1669_v15  ;;  %v1717_v15 = vld [vmem:[#allocation11 + $0x30] sm:$0xff]  }
  0x97   :  { %320 = vmatprep.subr.bf16.mxu0 %v1670_v17  ;;  %1525 = vmatpush3.bf16.msra.mxu1 %v1681_v24  ;;  %v1719_v17 = vld [vmem:[#allocation11 + $0x20] sm:$0xff]  }
  0x98   :  { %1526 = vmatprep.subr.bf16.mxu1 %v2021_v1 }
  0x9a   :  { %321 = vmatpush1.bf16.msra.mxu0 %v1672_v19  ;;  %v1721_v19 = vld [vmem:[#allocation11 + $0x10] sm:$0xff]  }
  0x9b   :  { %322 = vmatprep.subr.bf16.mxu0 %v1673_v20  ;;  %1527 = vmatpush3.bf16.msra.mxu1 %v1682_v26  ;;  %v482_v20 = vld [vmem:[%s2296_s6] sm:$0x3] }
  0x9c   :  { %1528 = vmatprep.subr.bf16.mxu1 %v2021_v1  ;;  %v487_v21 = vrot.slane %v482_v20, %v2194_v42 }
  0x9e   :  { %323 = vmatpush1.bf16.msra.mxu0 %v1675_v22 }
  0x9f   :  { %1529 = vmatpush3.bf16.msra.mxu1 %v1683_v27  ;;  %574 = vmatprep.subr.bf16.mxu0 %v1686_v29  ;;  %v1722_v29 = vld [vmem:[#allocation11 + $0x8] sm:$0xff]  }
  0xa0   :  { %1534 = vmatprep.subr.bf16.mxu1 %v2021_v1 }
  0xa1   :  { %341 = vmatmul.mubr.bf16.vlgmr.msra.gmra.mxu0 %v199_v25 }
  0xa2   :  { %606 = vmatprep.mubr.bf16.mxu0 %v2020_v0  ;;  %575 = vmatpush1.bf16.msra.mxu0 %v1684_v28 }
  0xa3   :  { %576 = vmatprep.subr.bf16.mxu0 %v1689_v30  ;;  %v1723_v30 = vld [vmem:[#allocation11] sm:$0xff]  }
  0xa6   :  { %577 = vmatpush1.bf16.msra.mxu0 %v1687_v31  ;;  %v1724_v31 = vld [vmem:[#allocation13 + $0x38] sm:$0xff]  }
  0xa7   :  { %578 = vmatprep.subr.bf16.mxu0 %v1692_v32  ;;  %v1725_v32 = vld [vmem:[#allocation13 + $0x30] sm:$0xff]  }
  0xaa   :  { %579 = vmatpush1.bf16.msra.mxu0 %v1690_v33  ;;  %v1726_v33 = vld [vmem:[#allocation13 + $0x28] sm:$0xff]  }
  0xab   :  { %580 = vmatprep.subr.bf16.mxu0 %v1695_v34  ;;  %v1727_v34 = vld [vmem:[#allocation13 + $0x20] sm:$0xff]  }
  0xae   :  { %581 = vmatpush1.bf16.msra.mxu0 %v1693_v35  ;;  %v1728_v35 = vld [vmem:[#allocation13 + $0x18] sm:$0xff]  }
  0xaf   :  { %582 = vmatprep.subr.bf16.mxu0 %v1698_v36  ;;  %v1729_v36 = vld [vmem:[#allocation13 + $0x10] sm:$0xff]  }
  0xb2   :  { %583 = vmatpush1.bf16.msra.mxu0 %v1696_v37  ;;  %v491_v37 = vrot.slane %v482_v20, %v2209_v62 }
  0xb3   :  { %584 = vmatprep.subr.bf16.mxu0 %v1701_v38  ;;  %v1399_v38 = vld [vmem:[%s2298_s8] ss:$0 sm:$0xff] }
  0xb6   :  { %585 = vmatpush1.bf16.msra.mxu0 %v1699_v39 }
  0xb7   :  { %586 = vmatprep.subr.bf16.mxu0 %v1704_v52  ;;  %v1734_v52 = vld [vmem:[#allocation14 + $0x74] ss:$8 sps:$4 sm:$0xff]  }
  0xba   :  { %587 = vmatpush1.bf16.msra.mxu0 %v1702_v53  ;;  %v1737_v53 = vld [vmem:[#allocation14 + $0x64] ss:$8 sps:$4 sm:$0xff]  }
  0xbb   :  { %588 = vmatprep.subr.bf16.mxu0 %v1707_v54  ;;  %v1735_v54 = vld [vmem:[#allocation14 + $0x60] ss:$8 sps:$4 sm:$0xff]  }
  0xbe   :  { %589 = vmatpush1.bf16.msra.mxu0 %v1705_v55  ;;  %v1740_v55 = vld [vmem:[#allocation14 + $0x54] ss:$8 sps:$4 sm:$0xff]  }
  0xbf   :  { %1554 = vmatprep.subr.bf16.mxu0 %v2021_v1 }
 0x161   :  { %v342_v45 = vpop.f32.mrf.mxu0 }
 0x162   :  { %v343_v46 = vadd.f32 %v342_v45, %v221_v44 }
 0x163   :  { %v344_v47 = vpop.f32.mrf.mxu0 }
 0x164   :  { %v349_v48 = vmax.f32 %v343_v46, 0.0  ;;  %v345_v4 = vadd.f32 %v344_v47, %v225_v63  ;;  %v1408_v63 = vld [vmem:[%s2300_s10] ss:$0 sm:$0xff] }
 0x165   :  { %v346_v49 = vpop.f32.mrf.mxu0 }
 0x166   :  { %v350_v50 = vpack.c.bf16 %v349_v48, %v349_v48  ;;  %v1730_v49 = vld [vmem:[#allocation13 + $0x8] sm:$0xff]  }
 0x167   :  { %v347_v51 = vpop.f32.mrf.mxu0 }
 0x168   :  { %1531 = vmatmul.mubr.bf16.vlgmr.msra.gmra.mxu1 %v350_v50  ;;  %v1731_v50 = vld [vmem:[#allocation13] sm:$0xff]   ;;  %v1732_v51 = vld [vmem:[#allocation14 + $0x70] ss:$8 sps:$4 sm:$0xff]  }
 0x169   :  { %1550 = vmatprep.mubr.msk.bf16.mxu1 %vm2022_vm0, %v2021_v1  ;;  %1535 = vmatpush3.bf16.msra.mxu1 %v1708_v56  ;;  %v1738_v56 = vld [vmem:[#allocation14 + $0x50] ss:$8 sps:$4 sm:$0xff]  }
 0x16a   :  { %1536 = vmatprep.subr.bf16.mxu1 %v2021_v1 }
 0x16d   :  { %1537 = vmatpush3.bf16.msra.mxu1 %v1709_v57  ;;  %v1741_v57 = vld [vmem:[#allocation14 + $0x40] ss:$8 sps:$4 sm:$0xff]  }
 0x16e   :  { %1538 = vmatprep.subr.bf16.mxu1 %v2021_v1 }
 0x171   :  { %1539 = vmatpush3.bf16.msra.mxu1 %v1710_v58  ;;  %v1746_v58 = vld [vmem:[#allocation14 + $0x34] ss:$8 sps:$4 sm:$0xff]  }
 0x172   :  { %1540 = vmatprep.subr.bf16.mxu1 %v2021_v1 }
 0x175   :  { %1541 = vmatpush3.bf16.msra.mxu1 %v1711_v59  ;;  %v1744_v59 = vld [vmem:[#allocation14 + $0x30] ss:$8 sps:$4 sm:$0xff]  }
 0x176   :  { %1542 = vmatprep.subr.bf16.mxu1 %v2021_v1 }
 0x179   :  { %1543 = vmatpush3.bf16.msra.mxu1 %v1712_v60  ;;  %v1749_v60 = vld [vmem:[#allocation14 + $0x24] ss:$8 sps:$4 sm:$0xff]  }
 0x17a   :  { %1544 = vmatprep.subr.bf16.mxu1 %v2021_v1 }
 0x17d   :  { %1545 = vmatpush3.bf16.msra.mxu1 %v1713_v61  ;;  %v1747_v61 = vld [vmem:[#allocation14 + $0x20] ss:$8 sps:$4 sm:$0xff]  }
 0x17e   :  { %1546 = vmatprep.subr.bf16.mxu1 %v2021_v1 }
 0x181   :  { %1547 = vmatpush3.bf16.msra.mxu1 %v1714_v12  ;;  %v1753_v12 = vld [vmem:[#allocation14] ss:$8 sps:$4 sm:$0xff]  }
 0x182   :  { %1548 = vmatprep.subr.bf16.mxu1 %v2021_v1 }
 0x185   :  { %1549 = vmatpush3.bf16.msra.mxu1 %v1715_v13  ;;  %v1756_v13 = vld [vmem:[#allocation16 + $0x38] sm:$0xff]  }
 0x186   :  { %1574 = vmatprep.subr.bf16.mxu1 %v2021_v1 }
 0x228   :  { %v456_v3 = vpop.f32.mrf.mxu1 }
 0x229   :  { %v457_v5 = vadd.f32 %v1374_v2, %v456_v3 }
 0x22a   :  { %v1532_v6 = vpop.f32.mrf.mxu1 }
 0x22b   :  { %v462_v7 = vadd.f32 %v457_v5, %v345_v4 }
 0x22c   :  { %v459_v8 = vpop.f32.mrf.mxu1 }
 0x22d   :  { %v463_v9 = vmax.f32 %v462_v7, 0.0 }
 0x22e   :  { %v1533_v10 = vpop.f32.mrf.mxu1 }
 0x22f   :  { %464 = vst [vmem:[#allocation19] sm:$0xff] %v463_v9  ;;  %v465_v11 = vpack.c.bf16 %v463_v9, %v463_v9  ;;  %v1752_v9 = vld [vmem:[#allocation14 + $0x14] ss:$8 sps:$4 sm:$0xff]   ;;  %v1750_v10 = vld [vmem:[#allocation14 + $0x10] ss:$8 sps:$4 sm:$0xff]  }
 0x231   :  { %607 = vmatmul.mubr.bf16.vlgmr.msra.gmra.mxu0 %v465_v11  ;;  %v1755_v11 = vld [vmem:[#allocation14 + $0x4] ss:$8 sps:$4 sm:$0xff]  }
 0x232   :  { %1570 = vmatprep.mubr.msk.bf16.mxu0 %vm2022_vm0, %v2021_v1  ;;  %1555 = vmatpush3.bf16.msra.mxu0 %v1716_v14  ;;  %v1757_v14 = vld [vmem:[#allocation16 + $0x30] sm:$0xff]  }
 0x233   :  { %1556 = vmatprep.subr.bf16.mxu0 %v2021_v1 }
 0x236   :  { %1557 = vmatpush3.bf16.msra.mxu0 %v1717_v15  ;;  %v1758_v15 = vld [vmem:[#allocation16 + $0x28] sm:$0xff]  }
 0x237   :  { %1558 = vmatprep.subr.bf16.mxu0 %v2021_v1 }
 0x23a   :  { %1559 = vmatpush3.bf16.msra.mxu0 %v1718_v16  ;;  %v1759_v16 = vld [vmem:[#allocation16 + $0x20] sm:$0xff]  }
 0x23b   :  { %1560 = vmatprep.subr.bf16.mxu0 %v2021_v1 }
 0x23e   :  { %1561 = vmatpush3.bf16.msra.mxu0 %v1719_v17  ;;  %v1760_v17 = vld [vmem:[#allocation16 + $0x18] sm:$0xff]  }
 0x23f   :  { %1562 = vmatprep.subr.bf16.mxu0 %v2021_v1 }
 0x242   :  { %1563 = vmatpush3.bf16.msra.mxu0 %v1720_v18  ;;  %v1761_v18 = vld [vmem:[#allocation16 + $0x10] sm:$0xff]  }
 0x243   :  { %1564 = vmatprep.subr.bf16.mxu0 %v2021_v1 }
 0x246   :  { %1565 = vmatpush3.bf16.msra.mxu0 %v1721_v19  ;;  %v1417_v19 = vld [vmem:[%s2302_s12] ss:$0 sm:$0xff] }
 0x247   :  { %1566 = vmatprep.subr.bf16.mxu0 %v2021_v1 }
 0x24a   :  { %1567 = vmatpush3.bf16.msra.mxu0 %v1722_v29  ;;  %v1763_v29 = vld [vmem:[#allocation16] sm:$0xff]  }
 0x24b   :  { %1568 = vmatprep.subr.bf16.mxu0 %v2021_v1 }
 0x24e   :  { %1569 = vmatpush3.bf16.msra.mxu0 %v1723_v30  ;;  %v1764_v30 = vld [vmem:[#allocation17 + $0x38] sm:$0xff]  }
 0x24f   :  { %1068 = vmatprep.subr.bf16.mxu0 %v1734_v52 }
 0x2f1   :  { %v608_v22 = vpop.f32.mrf.mxu0 }
 0x2f2   :  { %v609_v23 = vadd.f32 %v608_v22, %v487_v21 }
 0x2f3   :  { %v610_v24 = vpop.f32.mrf.mxu0 }
 0x2f4   :  { %v615_v25 = vmax.f32 %v609_v23, 0.0  ;;  %v611_v40 = vadd.f32 %v610_v24, %v491_v37 }
 0x2f5   :  { %v612_v26 = vpop.f32.mrf.mxu0 }
 0x2f6   :  { %v616_v27 = vpack.c.bf16 %v615_v25, %v615_v25 }
 0x2f7   :  { %v613_v28 = vpop.f32.mrf.mxu0 }
 0x2f8   :  { %1551 = vmatmul.mubr.bf16.vlgmr.msra.gmra.mxu1 %v616_v27  ;;  %v1762_v28 = vld [vmem:[#allocation16 + $0x8] sm:$0xff]  }
 0x2f9   :  { %1590 = vmatprep.mubr.msk.bf16.mxu1 %vm2022_vm0, %v2021_v1  ;;  %1575 = vmatpush3.bf16.msra.mxu1 %v1724_v31  ;;  %v1765_v31 = vld [vmem:[#allocation17 + $0x30] sm:$0xff]  }
 0x2fa   :  { %1576 = vmatprep.subr.bf16.mxu1 %v2021_v1 }
 0x2fd   :  { %1577 = vmatpush3.bf16.msra.mxu1 %v1725_v32  ;;  %v1766_v32 = vld [vmem:[#allocation17 + $0x28] sm:$0xff]  }
 0x2fe   :  { %1578 = vmatprep.subr.bf16.mxu1 %v2021_v1 }
 0x301   :  { %1579 = vmatpush3.bf16.msra.mxu1 %v1726_v33  ;;  %v1767_v33 = vld [vmem:[#allocation17 + $0x20] sm:$0xff]  }
 0x302   :  { %1580 = vmatprep.subr.bf16.mxu1 %v2021_v1 }
 0x305   :  { %1581 = vmatpush3.bf16.msra.mxu1 %v1727_v34  ;;  %v1768_v34 = vld [vmem:[#allocation17 + $0x18] sm:$0xff]  }
 0x306   :  { %1582 = vmatprep.subr.bf16.mxu1 %v2021_v1 }
 0x309   :  { %1583 = vmatpush3.bf16.msra.mxu1 %v1728_v35  ;;  %v1769_v35 = vld [vmem:[#allocation17 + $0x10] sm:$0xff]  }
 0x30a   :  { %1584 = vmatprep.subr.bf16.mxu1 %v2021_v1 }
 0x30d   :  { %1585 = vmatpush3.bf16.msra.mxu1 %v1729_v36  ;;  %v976_v36 = vld [vmem:[%s2304_s14] sm:$0x3] }
 0x30e   :  { %1586 = vmatprep.subr.bf16.mxu1 %v2021_v1  ;;  %v981_v37 = vrot.slane %v976_v36, %v2194_v42  ;;  %v1442_v42 = vld [vmem:[%s2306_s16] ss:$0 sm:$0xff]  ;;  %s1972_s16 = scalar_lea.vmem %s1345_s5, 640 }
 0x30f   :  { %p1973_p8 = scmp.ne.s32.totalorder %s1345_s5, %s1972_s16  ;;  %p1978_p10 = scmp.lt.s32.totalorder %s1972_s16, %s1972_s16 }
 0x311   :  { %1587 = vmatpush3.bf16.msra.mxu1 %v1730_v49  ;;  %p1979_p11 = por %p1978_p10, %p1977_p9 }
 0x312   :  { %1588 = vmatprep.subr.bf16.mxu1 %v2021_v1 }
 0x313   :  { %p1980_p12 = pnand %p1979_p11, %p1973_p8 }
 0x315   :  { %1589 = vmatpush3.bf16.msra.mxu1 %v1731_v50 }
 0x316   :  { %1594 = vmatprep.subr.bf16.mxu1 %v2021_v1 }
 0x3b8   :  { %v722_v39 = vpop.f32.mrf.mxu1 }
 0x3b9   :  { %v723_v41 = vadd.f32 %v1399_v38, %v722_v39 }
 0x3ba   :  { %v1552_v43 = vpop.f32.mrf.mxu1 }
 0x3bb   :  { %v728_v44 = vadd.f32 %v723_v41, %v611_v40 }
 0x3bc   :  { %v725_v45 = vpop.f32.mrf.mxu1 }
 0x3bd   :  { %v2242_v46 = vmax.f32 %v728_v44, 0.0 }
 0x3be   :  { %v1553_v47 = vpop.f32.mrf.mxu1 }
 0x3bf   :  { %730 = vst [vmem:[#allocation19 + $0x8] sm:$0xff] %v2242_v46  ;;  %v731_v48 = vpack.c.bf16 %v2242_v46, %v2242_v46  ;;  %v1771_v47 = vld [vmem:[#allocation17] sm:$0xff]  }
 0x3c1   :  { %1571 = vmatmul.mubr.bf16.vlgmr.msra.gmra.mxu0 %v731_v48  ;;  %v985_v48 = vrot.slane %v976_v36, %v2209_v62 }
 0x3c2   :  { %1100 = vmatprep.mubr.bf16.mxu0 %v2020_v0  ;;  %1069 = vmatpush1.bf16.msra.mxu0 %v1732_v51  ;;  %v1743_v0 = vld [vmem:[#allocation14 + $0x44] ss:$8 sps:$4 sm:$0xff]  }
 0x3c3   :  { %1070 = vmatprep.subr.bf16.mxu0 %v1737_v53 }
 0x3c6   :  { %1071 = vmatpush1.bf16.msra.mxu0 %v1735_v54 }
 0x3c7   :  { %1072 = vmatprep.subr.bf16.mxu0 %v1740_v55 }
 0x3ca   :  { %1073 = vmatpush1.bf16.msra.mxu0 %v1738_v56 }
 0x3cb   :  { %1074 = vmatprep.subr.bf16.mxu0 %v1743_v0 }
 0x3ce   :  { %1075 = vmatpush1.bf16.msra.mxu0 %v1741_v57 }
 0x3cf   :  { %1076 = vmatprep.subr.bf16.mxu0 %v1746_v58 }
 0x3d2   :  { %1077 = vmatpush1.bf16.msra.mxu0 %v1744_v59 }
 0x3d3   :  { %1078 = vmatprep.subr.bf16.mxu0 %v1749_v60 }
 0x3d6   :  { %1079 = vmatpush1.bf16.msra.mxu0 %v1747_v61 }
 0x3d7   :  { %1080 = vmatprep.subr.bf16.mxu0 %v1752_v9 }
 0x3da   :  { %1081 = vmatpush1.bf16.msra.mxu0 %v1750_v10 }
 0x3db   :  { %1082 = vmatprep.subr.bf16.mxu0 %v1755_v11 }
 0x3de   :  { %1083 = vmatpush1.bf16.msra.mxu0 %v1753_v12 }
 0x3df   :  { %1614 = vmatprep.subr.bf16.mxu0 %v2021_v1 }
 0x481   :  { %v837_v2 = vpop.f32.mrf.mxu0 }
 0x482   :  { %v838_v3 = vadd.f32 %v1408_v63, %v837_v2 }
 0x483   :  { %v1572_v4 = vpop.f32.mrf.mxu0 }
 0x484   :  { %v843_v5 = vmax.f32 %v838_v3, 0.0 }
 0x485   :  { %v840_v6 = vpop.f32.mrf.mxu0 }
 0x486   :  { %v844_v7 = vpack.c.bf16 %v843_v5, %v843_v5 }
 0x487   :  { %v1573_v8 = vpop.f32.mrf.mxu0 }
 0x488   :  { %1591 = vmatmul.mubr.bf16.vlgmr.msra.gmra.mxu1 %v844_v7 }
 0x489   :  { %1610 = vmatprep.mubr.msk.bf16.mxu1 %vm2022_vm0, %v2021_v1  ;;  %1595 = vmatpush3.bf16.msra.mxu1 %v1756_v13 }
 0x48a   :  { %1596 = vmatprep.subr.bf16.mxu1 %v2021_v1 }
 0x48d   :  { %1597 = vmatpush3.bf16.msra.mxu1 %v1757_v14 }
 0x48e   :  { %1598 = vmatprep.subr.bf16.mxu1 %v2021_v1 }
 0x491   :  { %1599 = vmatpush3.bf16.msra.mxu1 %v1758_v15 }
 0x492   :  { %1600 = vmatprep.subr.bf16.mxu1 %v2021_v1 }
 0x495   :  { %1601 = vmatpush3.bf16.msra.mxu1 %v1759_v16 }
 0x496   :  { %1602 = vmatprep.subr.bf16.mxu1 %v2021_v1 }
 0x499   :  { %1603 = vmatpush3.bf16.msra.mxu1 %v1760_v17 }
 0x49a   :  { %1604 = vmatprep.subr.bf16.mxu1 %v2021_v1 }
 0x49d   :  { %1605 = vmatpush3.bf16.msra.mxu1 %v1761_v18 }
 0x49e   :  { %1606 = vmatprep.subr.bf16.mxu1 %v2021_v1 }
 0x4a1   :  { %1607 = vmatpush3.bf16.msra.mxu1 %v1762_v28 }
 0x4a2   :  { %1608 = vmatprep.subr.bf16.mxu1 %v2021_v1 }
 0x4a5   :  { %1609 = vmatpush3.bf16.msra.mxu1 %v1763_v29 }
 0x548   :  { %v950_v20 = vpop.f32.mrf.mxu1 }
 0x549   :  { %v951_v21 = vadd.f32 %v1417_v19, %v950_v20 }
 0x54a   :  { %v1592_v22 = vpop.f32.mrf.mxu1 }
 0x54b   :  { %v956_v23 = vadd.f32 %v951_v21, %v2242_v46  ;;  %v1770_v46 = vld [vmem:[#allocation17 + $0x8] sm:$0xff]  }
 0x54c   :  { %v953_v24 = vpop.f32.mrf.mxu1 }
 0x54d   :  { %v957_v25 = vmax.f32 %v956_v23, 0.0 }
 0x54e   :  { %v1593_v26 = vpop.f32.mrf.mxu1 }
 0x54f   :  { %958 = vst [vmem:[#allocation19 + $0x10] sm:$0xff] %v957_v25  ;;  %v959_v27 = vpack.c.bf16 %v957_v25, %v957_v25 }
 0x551   :  { %1101 = vmatmul.mubr.bf16.vlgmr.msra.gmra.mxu0 %v959_v27 }
 0x552   :  { %1630 = vmatprep.mubr.msk.bf16.mxu0 %vm2022_vm0, %v2021_v1  ;;  %1615 = vmatpush3.bf16.msra.mxu0 %v1764_v30 }
 0x553   :  { %1616 = vmatprep.subr.bf16.mxu0 %v2021_v1 }
 0x556   :  { %1617 = vmatpush3.bf16.msra.mxu0 %v1765_v31 }
 0x557   :  { %1618 = vmatprep.subr.bf16.mxu0 %v2021_v1 }
 0x55a   :  { %1619 = vmatpush3.bf16.msra.mxu0 %v1766_v32 }
 0x55b   :  { %1620 = vmatprep.subr.bf16.mxu0 %v2021_v1 }
 0x55e   :  { %1621 = vmatpush3.bf16.msra.mxu0 %v1767_v33 }
 0x55f   :  { %1622 = vmatprep.subr.bf16.mxu0 %v2021_v1 }
 0x562   :  { %1623 = vmatpush3.bf16.msra.mxu0 %v1768_v34 }
 0x563   :  { %1624 = vmatprep.subr.bf16.mxu0 %v2021_v1 }
 0x566   :  { %1625 = vmatpush3.bf16.msra.mxu0 %v1769_v35 }
 0x567   :  { %1626 = vmatprep.subr.bf16.mxu0 %v2021_v1 }
 0x56a   :  { %1627 = vmatpush3.bf16.msra.mxu0 %v1770_v46 }
 0x56b   :  { %1628 = vmatprep.subr.bf16.mxu0 %v2021_v1  ;;  %v1451_v1 = vld [vmem:[%s2308_s18] ss:$0 sm:$0xff] }
 0x56e   :  { %1629 = vmatpush3.bf16.msra.mxu0 %v1771_v47 }
 0x611   :  { %v1102_v38 = vpop.f32.mrf.mxu0 }
 0x612   :  { %v1103_v39 = vadd.f32 %v1102_v38, %v981_v37 }
 0x613   :  { %v1104_v40 = vpop.f32.mrf.mxu0 }
 0x614   :  { %v1109_v41 = vmax.f32 %v1103_v39, 0.0  ;;  %v1105_v50 = vadd.f32 %v1104_v40, %v985_v48 }
 0x615   :  { %v1106_v43 = vpop.f32.mrf.mxu0 }
 0x616   :  { %v1110_v44 = vpack.c.bf16 %v1109_v41, %v1109_v41 }
 0x617   :  { %v1107_v45 = vpop.f32.mrf.mxu0 }
 0x618   :  { %1611 = vmatmul.mubr.bf16.vlgmr.msra.gmra.mxu1 %v1110_v44 }
 0x6d8   :  { %v1216_v49 = vpop.f32.mrf.mxu1 }
 0x6d9   :  { %v1217_v51 = vadd.f32 %v1442_v42, %v1216_v49 }
 0x6da   :  { %v1612_v52 = vpop.f32.mrf.mxu1 }
 0x6db   :  { %v1222_v53 = vadd.f32 %v1217_v51, %v1105_v50 }
 0x6dc   :  { %v1219_v54 = vpop.f32.mrf.mxu1 }
 0x6dd   :  { %v1223_v55 = vmax.f32 %v1222_v53, 0.0 }
 0x6de   :  { %v1613_v56 = vpop.f32.mrf.mxu1 }
 0x6df   :  { %1224 = vst [vmem:[#allocation19 + $0x18] sm:$0xff] %v1223_v55  ;;  %v1225_v0 = vpack.c.bf16 %v1223_v55, %v1223_v55 }
 0x6e1   :  { %1631 = vmatmul.mubr.bf16.vlgmr.msra.gmra.mxu0 %v1225_v0 }
 0x7a1   :  { %v1331_v62 = vpop.f32.mrf.mxu0 }
 0x7a2   :  { %v1332_v57 = vadd.f32 %v1451_v1, %v1331_v62 }
 0x7a3   :  { %v1632_v58 = vpop.f32.mrf.mxu0 }
 0x7a4   :  { %1337 = vst [vmem:[#allocation19 + $0x20] sm:$0xff] %v1332_v57 }
 0x7a5   :  { %v1334_v59 = vpop.f32.mrf.mxu0 }
 0x7a6   :  { %1983 = shalt.err (!%p1980_p12)
}
 0x7a7   :  { %1347 = dma.vmem_to_hbm [thread:$0]  %s1345_s5, 640, %s2309_s19, [#allocation4]   ;;  %v1633_v60 = vpop.f32.mrf.mxu0 }
 0x7a8   :  { %2004 = dma.done.wait [#allocation4], 640  }
 0x7a9   :  { %2005 = vsyncadd [#allocation4], 4294966656 }
 0x7aa   :  { %1351 = vsyncpa [#allocation3], 1 }
 0x7ab   :  { %1352 = vsyncpa [#allocation6], 1 }
 0x7ac   :  { %1353 = vsyncpa [#allocation9], 1 }
 0x7ad   :  { %1354 = vsyncpa [#allocation12], 1 }
 0x7ae   :  { %1355 = vsyncpa [#allocation15], 1 }
 0x7af   :  { %1356 = vsyncpa [#allocation18], 1 }
 0x7b0   :  { %1357 = vsyncpa [#allocation4], 1 }

</bundles_post_ra>
